<compile_context>
chip_gen: v6e
topology: v6e:2x2x1
jax: 0.10.0
libtpu: 0.0.40
codegen_flags: <defaults>
</compile_context>

<pallas_src>
import jax
import jax.numpy as jnp
from jax.experimental import pallas as pl
from jax.experimental.pallas import tpu as pltpu

OBS_DIM = 24        # BipedalWalker-v3 observation size
OBS_PAD = 32        # padded so bf16 w1 rows fill the 16-row sublane pack
FC1_DIMS = 1024
FC2_DIMS = 512
OUT_DIM = 1

DEFAULT_BATCH_TILE = 1024


def _round_up(x, m):
    return ((x + m - 1) // m) * m


def critic_kernel(x_ref, w1_ref, b1_ref, w2_ref, b2_ref, w3_ref, b3_ref, o_ref):
    # fc1 + ReLU  (bf16 MXU inputs, f32 accumulate, f32 bias / ReLU).
    x = x_ref[...].astype(jnp.bfloat16)
    h1 = jnp.dot(x, w1_ref[...], preferred_element_type=jnp.float32)
    h1 = jnp.maximum(h1 + b1_ref[...], 0.0)

    # fc2 + ReLU.
    h2 = jnp.dot(h1.astype(jnp.bfloat16), w2_ref[...],
                 preferred_element_type=jnp.float32)
    h2 = jnp.maximum(h2 + b2_ref[...], 0.0)

    # fc3 (out_features = 1): VPU multiply + lane reduction; result written
    # lane-dense as a (1, tb) row (XLU relayout of tb scalars is cheap).
    v = jnp.sum(h2 * w3_ref[...], axis=-1)          # (tb,)
    out = v.reshape(1, -1) + b3_ref[...]            # (1, tb)
    o_ref[...] = out.astype(o_ref.dtype)


def _choose_tile(batch, batch_tile):
    """Returns (tile, padded_batch). Tile is 8-aligned; >=2 steps for big batches."""
    b8 = _round_up(max(batch, 1), 8)
    if b8 < 256:
        # Tiny batch: single grid step, tile == (padded) batch.
        return b8, b8
    # >= 256 rows: tile is a multiple of 128 (keeps the lane-dense out_spec
    # legal) and chosen so the grid has >= 2 steps -> both v7x TCs get work.
    cap = max(128, (batch_tile // 128) * 128)
    half = (b8 + 1) // 2
    tb = min(cap, max(128, _round_up(half, 128)))
    return tb, _round_up(b8, tb)


def critic_forward(state, params, *, batch_tile=DEFAULT_BATCH_TILE):
    """state: (B, 24) float32. Returns (B, 1) float32 value estimates."""
    w1, b1, w2, b2, w3, b3 = params
    B, obs = state.shape

    tb, padded_B = _choose_tile(B, batch_tile)

    # Single pad: batch rows up to padded_B, obs columns 24 -> 32 (w1 rows are
    # zero-padded to match in init_params, so the extra columns contribute 0).
    state = jnp.pad(state.astype(jnp.float32),
                    ((0, padded_B - B), (0, OBS_PAD - obs)))

    grid = (padded_B // tb,)

    # Weights / biases: full-array blocks with a constant index_map -> DMA'd
    # once and kept VMEM-resident across all batch steps.
    def resident(arr):
        return pl.BlockSpec(arr.shape, lambda i: (0,) * arr.ndim)

    out = pl.pallas_call(
        critic_kernel,
        out_shape=jax.ShapeDtypeStruct((1, padded_B), jnp.float32),
        grid_spec=pltpu.PrefetchScalarGridSpec(
            num_scalar_prefetch=0,
            grid=grid,
            in_specs=[
                pl.BlockSpec((tb, OBS_PAD), lambda i: (i, 0)),   # state tile
                resident(w1), resident(b1),
                resident(w2), resident(b2),
                resident(w3), resident(b3),
            ],
            # Lane-dense (1, tb) row per grid step.
            out_specs=pl.BlockSpec((1, tb), lambda i: (0, i)),
        ),
        compiler_params=pltpu.CompilerParams(
            dimension_semantics=("parallel",),   # megacore split on v7x
            vmem_limit_bytes=32 << 20,           # v7x physical VMEM is 64 MiB
        ),
    )(state, w1, b1, w2, b2, w3, b3)

    return out[0, :B].reshape(B, OUT_DIM)


def init_linear(key, fan_in, fan_out, w_dtype=jnp.float32, pad_in_to=None):
    """torch.nn.Linear default init: U(-1/sqrt(fan_in), 1/sqrt(fan_in))."""
    kw, kb = jax.random.split(key)
    bound = 1.0 / (fan_in ** 0.5)
    # Stored as (in, out): the kernel computes x @ W  (== torch's x @ W.T + b).
    w = jax.random.uniform(kw, (fan_in, fan_out), jnp.float32, -bound, bound)
    b = jax.random.uniform(kb, (1, fan_out), jnp.float32, -bound, bound)
    if pad_in_to is not None and pad_in_to > fan_in:
        w = jnp.pad(w, ((0, pad_in_to - fan_in), (0, 0)))
    return w.astype(w_dtype), b


def init_params(key):
    k1, k2, k3 = jax.random.split(key, 3)
    # Large weights stored in bf16 (perf); biases and fc3 stay f32.  Exact f32
    # parity with the PyTorch module would require keeping w1/w2 in f32.
    w1, b1 = init_linear(k1, OBS_DIM, FC1_DIMS, jnp.bfloat16, pad_in_to=OBS_PAD)
    w2, b2 = init_linear(k2, FC1_DIMS, FC2_DIMS, jnp.bfloat16)
    w3_col, b3 = init_linear(k3, FC2_DIMS, OUT_DIM, jnp.float32)
    w3 = w3_col.reshape(1, FC2_DIMS)     # (1, 512) row for the VPU reduction
    return (w1, b1, w2, b2, w3, b3)


def reference_forward(state, params):
    """Plain-JAX reference of the same (bf16-weight) forward pass."""
    w1, b1, w2, b2, w3, b3 = params
    x = jnp.pad(state.astype(jnp.float32),
                ((0, 0), (0, OBS_PAD - state.shape[1]))).astype(jnp.bfloat16)
    h1 = jnp.maximum(
        jnp.dot(x, w1, preferred_element_type=jnp.float32) + b1, 0.0)
    h2 = jnp.maximum(
        jnp.dot(h1.astype(jnp.bfloat16), w2,
                preferred_element_type=jnp.float32) + b2, 0.0)
    return jnp.sum(h2 * w3, axis=-1, keepdims=True) + b3


if __name__ == "__main__":
    key = jax.random.PRNGKey(0)
    kp, kx1, kx2 = jax.random.split(key, 3)

    params = init_params(kp)

    # Per-step critic eval (B=2): single-tile path.
    state_small = jax.random.normal(kx1, (2, OBS_DIM), dtype=jnp.float32)
    out_small = jax.block_until_ready(critic_forward(state_small, params))
    ref_small = reference_forward(state_small, params)
    assert out_small.shape == (2, OUT_DIM), out_small.shape
    assert jnp.allclose(out_small, ref_small, atol=1e-2, rtol=1e-2), (
        out_small, ref_small)

    # Training-sized, non-tile-multiple batch: multi-step lane-dense path
    # (tile = 256, padded batch = 512, grid = 2 -> exercises megacore split).
    state_big = jax.random.normal(kx2, (500, OBS_DIM), dtype=jnp.float32)
    out_big = jax.block_until_ready(critic_forward(state_big, params))
    ref_big = reference_forward(state_big, params)
    assert out_big.shape == (500, OUT_DIM), out_big.shape
    assert jnp.allclose(out_big, ref_big, atol=1e-2, rtol=1e-2), (
        float(jnp.max(jnp.abs(out_big - ref_big))))

    print("KERNEL_OK")
</pallas_src>

<mosaic_0001>
module attributes {stable_mosaic.version = 11 : i64} {
  func.func @critic_kernel(%arg0: i32, %arg1: memref<8x32xf32, #tpu.memory_space<vmem>>, %arg2: memref<32x1024xbf16, #tpu.memory_space<vmem>>, %arg3: memref<1x1024xf32, #tpu.memory_space<vmem>>, %arg4: memref<1024x512xbf16, #tpu.memory_space<vmem>>, %arg5: memref<1x512xf32, #tpu.memory_space<vmem>>, %arg6: memref<1x512xf32, #tpu.memory_space<vmem>>, %arg7: memref<1x1xf32, #tpu.memory_space<vmem>>, %arg8: memref<1x8xf32, #tpu.memory_space<vmem>>) attributes {dimension_semantics = [#tpu.dimension_semantics<parallel>], iteration_bounds = array<i64: 1>, scalar_prefetch = 0 : i64, scratch_operands = 0 : i64, tpu.core_type = #tpu.core_type<tc>, window_params = [{transform_indices = @transform_0, window_bounds = array<i64: 8, 32>}, {pipeline_mode = #tpu.pipeline_mode<synchronous>, transform_indices = @transform_1, window_bounds = array<i64: 32, 1024>}, {pipeline_mode = #tpu.pipeline_mode<synchronous>, transform_indices = @transform_2, window_bounds = array<i64: 1, 1024>}, {pipeline_mode = #tpu.pipeline_mode<synchronous>, transform_indices = @transform_3, window_bounds = array<i64: 1024, 512>}, {pipeline_mode = #tpu.pipeline_mode<synchronous>, transform_indices = @transform_4, window_bounds = array<i64: 1, 512>}, {pipeline_mode = #tpu.pipeline_mode<synchronous>, transform_indices = @transform_5, window_bounds = array<i64: 1, 512>}, {pipeline_mode = #tpu.pipeline_mode<synchronous>, transform_indices = @transform_6, window_bounds = array<i64: 1, 1>}, {transform_indices = @transform_7, window_bounds = array<i64: 1, 8>}]} {
    %c0 = arith.constant 0 : index
    %c0_0 = arith.constant 0 : index
    %0 = vector.load %arg1[%c0, %c0_0] : memref<8x32xf32, #tpu.memory_space<vmem>>, vector<8x32xf32>
    %1 = arith.truncf %0 : vector<8x32xf32> to vector<8x32xbf16>
    %c0_1 = arith.constant 0 : index
    %c0_2 = arith.constant 0 : index
    %2 = vector.load %arg2[%c0_1, %c0_2] : memref<32x1024xbf16, #tpu.memory_space<vmem>>, vector<32x1024xbf16>
    %cst = arith.constant dense<0.000000e+00> : vector<8x1024xf32>
    %3 = tpu.matmul %1, %2, %cst {dimension_numbers = #tpu.dot_dimension_numbers<[1], [0], [0], [1], [0, 0, 1, 1], [], []>} : vector<8x32xbf16>, vector<32x1024xbf16>, vector<8x1024xf32> -> vector<8x1024xf32>
    %c0_3 = arith.constant 0 : index
    %c0_4 = arith.constant 0 : index
    %4 = vector.load %arg3[%c0_3, %c0_4] : memref<1x1024xf32, #tpu.memory_space<vmem>>, vector<1x1024xf32>
    %5 = vector.broadcast %4 : vector<1x1024xf32> to vector<8x1024xf32>
    %6 = arith.addf %3, %5 : vector<8x1024xf32>
    %cst_5 = arith.constant 0.000000e+00 : f32
    %7 = vector.broadcast %cst_5 : f32 to vector<8x1024xf32>
    %8 = arith.maximumf %6, %7 : vector<8x1024xf32>
    %9 = arith.truncf %8 : vector<8x1024xf32> to vector<8x1024xbf16>
    %c0_6 = arith.constant 0 : index
    %c0_7 = arith.constant 0 : index
    %10 = vector.load %arg4[%c0_6, %c0_7] : memref<1024x512xbf16, #tpu.memory_space<vmem>>, vector<1024x512xbf16>
    %cst_8 = arith.constant dense<0.000000e+00> : vector<8x512xf32>
    %11 = tpu.matmul %9, %10, %cst_8 {dimension_numbers = #tpu.dot_dimension_numbers<[1], [0], [0], [1], [0, 0, 1, 1], [], []>} : vector<8x1024xbf16>, vector<1024x512xbf16>, vector<8x512xf32> -> vector<8x512xf32>
    %c0_9 = arith.constant 0 : index
    %c0_10 = arith.constant 0 : index
    %12 = vector.load %arg5[%c0_9, %c0_10] : memref<1x512xf32, #tpu.memory_space<vmem>>, vector<1x512xf32>
    %13 = vector.broadcast %12 : vector<1x512xf32> to vector<8x512xf32>
    %14 = arith.addf %11, %13 : vector<8x512xf32>
    %cst_11 = arith.constant 0.000000e+00 : f32
    %15 = vector.broadcast %cst_11 : f32 to vector<8x512xf32>
    %16 = arith.maximumf %14, %15 : vector<8x512xf32>
    %c0_12 = arith.constant 0 : index
    %c0_13 = arith.constant 0 : index
    %17 = vector.load %arg6[%c0_12, %c0_13] : memref<1x512xf32, #tpu.memory_space<vmem>>, vector<1x512xf32>
    %18 = vector.broadcast %17 : vector<1x512xf32> to vector<8x512xf32>
    %19 = arith.mulf %16, %18 : vector<8x512xf32>
    %cst_14 = arith.constant dense<0.000000e+00> : vector<8xf32>
    %20 = vector.multi_reduction <add>, %19, %cst_14 [1] : vector<8x512xf32> to vector<8xf32>
    %21 = vector.shape_cast %20 : vector<8xf32> to vector<1x8xf32>
    %c0_15 = arith.constant 0 : index
    %c0_16 = arith.constant 0 : index
    %22 = vector.load %arg7[%c0_15, %c0_16] : memref<1x1xf32, #tpu.memory_space<vmem>>, vector<1x1xf32>
    %23 = vector.broadcast %22 : vector<1x1xf32> to vector<1x8xf32>
    %24 = arith.addf %21, %23 : vector<1x8xf32>
    %c0_17 = arith.constant 0 : index
    %c0_18 = arith.constant 0 : index
    %25 = vector.load %arg8[%c0_17, %c0_18] : memref<1x8xf32, #tpu.memory_space<vmem>>, vector<1x8xf32>
    tpu.vector_store %arg8[%c0_17, %c0_18], %24 {strides = array<i32>} : memref<1x8xf32, #tpu.memory_space<vmem>>, vector<1x8xf32>,
    return
  }
  func.func @transform_0(%arg0: i32) -> (i32, i32) {
    %c0_i32 = arith.constant 0 : i32
    %c0_i32_0 = arith.constant 0 : i32
    return %arg0, %c0_i32 : i32, i32
  }
  func.func @transform_1(%arg0: i32) -> (i32, i32) {
    %c0_i32 = arith.constant 0 : i32
    %c0_i32_0 = arith.constant 0 : i32
    %c0_i32_1 = arith.constant 0 : i32
    return %c0_i32, %c0_i32_0 : i32, i32
  }
  func.func @transform_2(%arg0: i32) -> (i32, i32) {
    %c0_i32 = arith.constant 0 : i32
    %c0_i32_0 = arith.constant 0 : i32
    %c0_i32_1 = arith.constant 0 : i32
    return %c0_i32, %c0_i32_0 : i32, i32
  }
  func.func @transform_3(%arg0: i32) -> (i32, i32) {
    %c0_i32 = arith.constant 0 : i32
    %c0_i32_0 = arith.constant 0 : i32
    %c0_i32_1 = arith.constant 0 : i32
    return %c0_i32, %c0_i32_0 : i32, i32
  }
  func.func @transform_4(%arg0: i32) -> (i32, i32) {
    %c0_i32 = arith.constant 0 : i32
    %c0_i32_0 = arith.constant 0 : i32
    %c0_i32_1 = arith.constant 0 : i32
    return %c0_i32, %c0_i32_0 : i32, i32
  }
  func.func @transform_5(%arg0: i32) -> (i32, i32) {
    %c0_i32 = arith.constant 0 : i32
    %c0_i32_0 = arith.constant 0 : i32
    %c0_i32_1 = arith.constant 0 : i32
    return %c0_i32, %c0_i32_0 : i32, i32
  }
  func.func @transform_6(%arg0: i32) -> (i32, i32) {
    %c0_i32 = arith.constant 0 : i32
    %c0_i32_0 = arith.constant 0 : i32
    %c0_i32_1 = arith.constant 0 : i32
    return %c0_i32, %c0_i32_0 : i32, i32
  }
  func.func @transform_7(%arg0: i32) -> (i32, i32) {
    %c0_i32 = arith.constant 0 : i32
    %c0_i32_0 = arith.constant 0 : i32
    return %c0_i32, %arg0 : i32, i32
  }
}

</mosaic_0001>

<bundles_post_ra>
// kernel: tpu_custom_call.1
= control target key start
LH: loop header
LB: loop body
LE: loop exit
PB: predicated region body
PF: predicated region fallthrough
CT: control target
= control target key end

     0   :  { %s3303_s0 = inlined_call_operand.hbm [shape: f32[8,32], index: 0, kind: input, shape index: {}]   ;;  %s3304_s1 = inlined_call_operand.hbm [shape: bf16[32,1024], index: 1, kind: input, shape index: {}]   ;;  %s3305_s2 = inlined_call_operand.hbm [shape: f32[1,1024], index: 2, kind: input, shape index: {}]   ;;  %s3306_s3 = inlined_call_operand.hbm [shape: bf16[1024,512], index: 3, kind: input, shape index: {}]   ;;  %s3307_s4 = inlined_call_operand.vmem [shape: f32[1,512], index: 4, kind: input, shape index: {}]   ;;  %s3308_s5 = inlined_call_operand.vmem [shape: f32[1,512], index: 5, kind: input, shape index: {}]   ;;  %s3309_s6 = inlined_call_operand.<no memory space> [shape: f32[1,1], index: 6, kind: input, shape index: {}]   ;;  %s3310_s7 = inlined_call_operand.hbm [shape: f32[1,8], index: 7, kind: output, shape index: {}]  }
   0x1   :  { %v12_v0 = vstv %s3309_s6 }
   0x2   :  { %13 = vst [vmem:[#allocation2] sm:$0x1] %v12_v0 }
   0x3   :  { %14 = vsyncpa [#allocation4], 0 }
   0x4   :  { %15 = vsyncpa [#allocation7], 0 }
   0x5   :  { %16 = vsyncpa [#allocation10], 0 }
   0x6   :  { %17 = vsyncpa [#allocation5], 0  ;;  %s3143_s26 = smov [#allocation6]  }
   0x7   :  { %s33_s27 = sshll.u32 %s3143_s26, 4  ;;  %s34_s27 = int_to_ptr.vmem [resolvable:$true] %s33_s27 }
   0x8   :  { %s3043_s28 = scalar_lea.vmem %s34_s27, 2048  ;;  %p3048_p1 = scmp.lt.s32.totalorder %s34_s27, %s34_s27 }
   0x9   :  { %p3044_p0 = scmp.ne.s32.totalorder %s34_s27, %s3043_s28  ;;  %p3049_p2 = scmp.lt.s32.totalorder %s3043_s28, %s3043_s28 }
   0xb   :  { %p3050_p3 = por %p3049_p2, %p3048_p1 }
   0xd   :  { %p3051_p4 = pnand %p3050_p3, %p3044_p0 }
   0xf   :  { %3054 = shalt.err (!%p3051_p4)
}
  0x10   :  { %s3144_s29 = smov 512   ;;  %s3145_s30 = smov 32  }
  0x11   :  { %39 = dma.hbm_to_vmem [thread:$0]  %s3304_s1, 2048, %s34_s27, [#allocation7], %s3144_s29, %s3144_s29, %s3145_s30  }
  0x12   :  { %s3146_s6 = smov [#allocation3]   ;;  %s3147_s11 = smov [#allocation8]  }
  0x13   :  { %s24_s10 = sshll.u32 %s3146_s6, 4  ;;  %s46_s12 = sshll.u32 %s3147_s11, 4  ;;  %s25_s10 = int_to_ptr.vmem [resolvable:$true] %s24_s10  ;;  %s47_s12 = int_to_ptr.vmem [resolvable:$true] %s46_s12 }
  0x14   :  { %s3063_s13 = scalar_lea.vmem %s25_s10, 128  ;;  %p3068_p6 = scmp.lt.s32.totalorder %s25_s10, %s25_s10 }
  0x15   :  { %p3064_p5 = scmp.ne.s32.totalorder %s25_s10, %s3063_s13  ;;  %p3069_p7 = scmp.lt.s32.totalorder %s3063_s13, %s3063_s13 }
  0x17   :  { %p3070_p8 = por %p3069_p7, %p3068_p6 }
  0x19   :  { %p3071_p9 = pnand %p3070_p8, %p3064_p5 }
  0x1b   :  { %3074 = shalt.err (!%p3071_p9)
}
  0x1c   :  { %27 = dma.hbm_to_vmem [thread:$0]  %s3303_s0, 128, %s25_s10, [#allocation4]  }
  0x1d   :  { %s3083_s16 = scalar_lea.vmem %s47_s12, 128  ;;  %p3088_p11 = scmp.lt.s32.totalorder %s47_s12, %s47_s12 }
  0x1e   :  { %p3084_p10 = scmp.ne.s32.totalorder %s47_s12, %s3083_s16  ;;  %p3089_p12 = scmp.lt.s32.totalorder %s3083_s16, %s3083_s16 }
  0x20   :  { %p3090_p13 = por %p3089_p12, %p3088_p11 }
  0x22   :  { %p3091_p0 = pnand %p3090_p13, %p3084_p10 }
  0x24   :  { %3094 = shalt.err (!%p3091_p0)
}
  0x25   :  { %49 = dma.hbm_to_vmem [thread:$0]  %s3305_s2, 128, %s47_s12, [#allocation7]  }
  0x26   :  { %s3148_s18 = smov [#allocation9]  }
  0x27   :  { %s55_s19 = sshll.u32 %s3148_s18, 4  ;;  %s56_s19 = int_to_ptr.vmem [resolvable:$true] %s55_s19 }
  0x28   :  { %s3103_s20 = scalar_lea.vmem %s56_s19, 32768  ;;  %p3108_p2 = scmp.lt.s32.totalorder %s56_s19, %s56_s19 }
  0x29   :  { %p3104_p1 = scmp.ne.s32.totalorder %s56_s19, %s3103_s20  ;;  %p3109_p3 = scmp.lt.s32.totalorder %s3103_s20, %s3103_s20 }
  0x2b   :  { %p3110_p4 = por %p3109_p3, %p3108_p2 }
  0x2d   :  { %p3111_p5 = pnand %p3110_p4, %p3104_p1 }
  0x2f   :  { %3114 = shalt.err (!%p3111_p5)
}
  0x30   :  { %s3149_s0 = smov 256   ;;  %s3150_s21 = smov 16  }
  0x31   :  { %61 = dma.hbm_to_vmem [thread:$0]  %s3306_s3, 32768, %s56_s19, [#allocation10], %s3149_s0, %s3149_s0, %s3150_s21  }
  0x32   :  { %3135 = dma.done.wait [#allocation4], 128  }
  0x33   :  { %3136 = vsyncadd [#allocation4], 4294967168 }
  0x34   :  { %3137 = dma.done.wait [#allocation7], 2176  }
  0x35   :  { %3138 = vsyncadd [#allocation7], 4294965120 }
  0x36   :  { %3139 = dma.done.wait [#allocation10], 32768  }
  0x37   :  { %3140 = vsyncadd [#allocation10], 4294934528  ;;  %v3151_v1 = vmov 0   ;;  %v91_v2 = vld [vmem:[#allocation6 + $0x40] sm:$0xff]  ;;  %v92_v4 = vld [vmem:[#allocation6 + $0x48] sm:$0xff]  ;;  %vm221_vm0 = vcmask 261120  }
  0x38   :  { %257 = vmatprep.mubr.bf16.mxu0 %v3151_v1  ;;  %298 = vmatprep.mubr.bf16.mxu1 %v3151_v1  ;;  %v95_v3 = vld [vmem:[#allocation6 + $0x60] sm:$0xff]  ;;  %v96_v6 = vld [vmem:[#allocation6 + $0x68] sm:$0xff]  ;;  %v93_v16 = vld [vmem:[#allocation6 + $0x50] sm:$0xff]  ;;  %vm2345_vm1 = vcmask 57344  }
  0x39   :  { %2650 = vset.pattern.permute.xlu0 %v3151_v1  ;;  %v2373_v5 = vcombine.high %v91_v2, %v95_v3  ;;  %v2372_v7 = vcombine.low %v91_v2, %v95_v3  ;;  %v83_v8 = vld [vmem:[#allocation6] sm:$0xff]  ;;  %v2375_v10 = vcombine.high %v92_v4, %v96_v6  ;;  %v2374_v11 = vcombine.low %v92_v4, %v96_v6  ;;  %v84_v13 = vld [vmem:[#allocation6 + $0x8] sm:$0xff]  ;;  %v97_v17 = vld [vmem:[#allocation6 + $0x70] sm:$0xff] }
  0x3a   :  { %v87_v9 = vld [vmem:[#allocation6 + $0x20] sm:$0xff]  ;;  %v88_v14 = vld [vmem:[#allocation6 + $0x28] sm:$0xff]  ;;  %v94_v18 = vld [vmem:[#allocation6 + $0x58] sm:$0xff]  ;;  %v2377_v23 = vcombine.high %v93_v16, %v97_v17  ;;  %v2376_v30 = vcombine.low %v93_v16, %v97_v17 }
  0x3b   :  { %v2365_v12 = vcombine.high %v83_v8, %v87_v9  ;;  %237 = vmatprep.subr.bf16.mxu0 %v2373_v5  ;;  %v2367_v15 = vcombine.high %v84_v13, %v88_v14  ;;  %278 = vmatprep.subr.bf16.mxu1 %v2375_v10  ;;  %v2364_v19 = vcombine.low %v83_v8, %v87_v9  ;;  %v81_v20 = vld [vmem:[#allocation3] sm:$0xff]  ;;  %v85_v24 = vld [vmem:[#allocation6 + $0x10] sm:$0xff] }
  0x3c   :  { %238 = vmatpush1.bf16.msra.mxu0 %v2372_v7  ;;  %v98_v21 = vld [vmem:[#allocation6 + $0x78] sm:$0xff]  ;;  %279 = vmatpush1.bf16.msra.mxu1 %v2374_v11  ;;  %v2366_v22 = vcombine.low %v84_v13, %v88_v14  ;;  %v89_v26 = vld [vmem:[#allocation6 + $0x30] sm:$0xff]  ;;  %v82_v28 = vpack.c.bf16 %v81_v20, %v81_v20 }
  0x3d   :  { %239 = vmatprep.subr.bf16.mxu0 %v2365_v12  ;;  %280 = vmatprep.subr.bf16.mxu1 %v2367_v15  ;;  %v2379_v25 = vcombine.high %v94_v18, %v98_v21  ;;  %v86_v27 = vld [vmem:[#allocation6 + $0x18] sm:$0xff]  ;;  %v2378_v31 = vcombine.low %v94_v18, %v98_v21  ;;  %v2369_v32 = vcombine.high %v85_v24, %v89_v26 }
  0x3e   :  { %v90_v29 = vld [vmem:[#allocation6 + $0x38] sm:$0xff]  ;;  %v2368_v34 = vcombine.low %v85_v24, %v89_v26 }
  0x3f   :  { %v2371_v33 = vcombine.high %v86_v27, %v90_v29  ;;  %v2370_v35 = vcombine.low %v86_v27, %v90_v29  ;;  %v2653_v36 = vld [vmem:[#allocation9 + $0xe4] ss:$16 sps:$4 sm:$0xff]   ;;  %v2651_v38 = vld [vmem:[#allocation9 + $0xe0] ss:$16 sps:$4 sm:$0xff]  }
  0x40   :  { %240 = vmatpush1.bf16.msra.mxu0 %v2364_v19  ;;  %281 = vmatpush1.bf16.msra.mxu1 %v2366_v22  ;;  %v2656_v37 = vld [vmem:[#allocation9 + $0x2e4] ss:$16 sps:$4 sm:$0xff]   ;;  %v2654_v39 = vld [vmem:[#allocation9 + $0x2e0] ss:$16 sps:$4 sm:$0xff]  }
  0x41   :  { %319 = vmatprep.subr.bf16.mxu0 %v2377_v23  ;;  %360 = vmatprep.subr.bf16.mxu1 %v2379_v25  ;;  %v2659_v40 = vld [vmem:[#allocation9 + $0xc4] ss:$16 sps:$4 sm:$0xff]   ;;  %v2657_v42 = vld [vmem:[#allocation9 + $0xc0] ss:$16 sps:$4 sm:$0xff]  }
  0x42   :  { %v2662_v41 = vld [vmem:[#allocation9 + $0x2c4] ss:$16 sps:$4 sm:$0xff]   ;;  %v2660_v43 = vld [vmem:[#allocation9 + $0x2c0] ss:$16 sps:$4 sm:$0xff]  }
  0x43   :  { %2380 = vmatmul.mubr.msk.bf16.vlgmr.msra.gmra.mxu0 %vm221_vm0, %v82_v28  ;;  %2381 = vmatmul.mubr.msk.bf16.vlgmr.msra.gmra.mxu1 %vm221_vm0, %v82_v28  ;;  %v2665_v44 = vld [vmem:[#allocation9 + $0xa4] ss:$16 sps:$4 sm:$0xff]   ;;  %v2663_v46 = vld [vmem:[#allocation9 + $0xa0] ss:$16 sps:$4 sm:$0xff]  }
  0x44   :  { %320 = vmatpush1.bf16.msra.mxu0 %v2376_v30  ;;  %361 = vmatpush1.bf16.msra.mxu1 %v2378_v31  ;;  %v2668_v45 = vld [vmem:[#allocation9 + $0x2a4] ss:$16 sps:$4 sm:$0xff]   ;;  %v2666_v47 = vld [vmem:[#allocation9 + $0x2a0] ss:$16 sps:$4 sm:$0xff]  }
  0x45   :  { %321 = vmatprep.subr.bf16.mxu0 %v2369_v32  ;;  %362 = vmatprep.subr.bf16.mxu1 %v2371_v33  ;;  %v2671_v48 = vld [vmem:[#allocation9 + $0x84] ss:$16 sps:$4 sm:$0xff]   ;;  %v2669_v50 = vld [vmem:[#allocation9 + $0x80] ss:$16 sps:$4 sm:$0xff]  }
  0x46   :  { %339 = vmatprep.mubr.bf16.mxu0 %v3151_v1  ;;  %380 = vmatprep.mubr.bf16.mxu1 %v3151_v1  ;;  %v2674_v49 = vld [vmem:[#allocation9 + $0x284] ss:$16 sps:$4 sm:$0xff]   ;;  %v2672_v51 = vld [vmem:[#allocation9 + $0x280] ss:$16 sps:$4 sm:$0xff]  }
  0x47   :  { %v2677_v52 = vld [vmem:[#allocation9 + $0x64] ss:$16 sps:$4 sm:$0xff]   ;;  %v2675_v54 = vld [vmem:[#allocation9 + $0x60] ss:$16 sps:$4 sm:$0xff]  }
  0x48   :  { %322 = vmatpush1.bf16.msra.mxu0 %v2368_v34  ;;  %363 = vmatpush1.bf16.msra.mxu1 %v2370_v35  ;;  %v2680_v53 = vld [vmem:[#allocation9 + $0x264] ss:$16 sps:$4 sm:$0xff]   ;;  %v2678_v55 = vld [vmem:[#allocation9 + $0x260] ss:$16 sps:$4 sm:$0xff]  }
  0x49   :  { %1963 = vmatprep.subr.bf16.mxu0 %v2653_v36  ;;  %2004 = vmatprep.subr.bf16.mxu1 %v2656_v37  ;;  %v2683_v56 = vld [vmem:[#allocation9 + $0x44] ss:$16 sps:$4 sm:$0xff]   ;;  %v2681_v58 = vld [vmem:[#allocation9 + $0x40] ss:$16 sps:$4 sm:$0xff]  }
  0x4a   :  { %v2686_v57 = vld [vmem:[#allocation9 + $0x244] ss:$16 sps:$4 sm:$0xff]   ;;  %v2684_v59 = vld [vmem:[#allocation9 + $0x240] ss:$16 sps:$4 sm:$0xff]  }
  0x4b   :  { %2382 = vmatmul.mubr.msk.bf16.vlgmr.msra.gmra.mxu0 %vm221_vm0, %v82_v28  ;;  %2383 = vmatmul.mubr.msk.bf16.vlgmr.msra.gmra.mxu1 %vm221_vm0, %v82_v28  ;;  %v2689_v60 = vld [vmem:[#allocation9 + $0x24] ss:$16 sps:$4 sm:$0xff]   ;;  %v2687_v62 = vld [vmem:[#allocation9 + $0x20] ss:$16 sps:$4 sm:$0xff]  }
  0x4c   :  { %1964 = vmatpush1.bf16.msra.mxu0 %v2651_v38  ;;  %2005 = vmatpush1.bf16.msra.mxu1 %v2654_v39  ;;  %v2692_v61 = vld [vmem:[#allocation9 + $0x224] ss:$16 sps:$4 sm:$0xff]   ;;  %v2690_v63 = vld [vmem:[#allocation9 + $0x220] ss:$16 sps:$4 sm:$0xff]   ;;  %v101_v38 = vlaneseq }
  0x4d   :  { %1965 = vmatprep.subr.bf16.mxu0 %v2659_v40  ;;  %2006 = vmatprep.subr.bf16.mxu1 %v2662_v41  ;;  %v2695_v0 = vld [vmem:[#allocation9 + $0x4] ss:$16 sps:$4 sm:$0xff]   ;;  %v2693_v1 = vld [vmem:[#allocation9] ss:$16 sps:$4 sm:$0xff]   ;;  %v3218_v41 = vld [vmem:[#allocation8] sm:$0xff] }
  0x4e   :  { %v2698_v2 = vld [vmem:[#allocation9 + $0x204] ss:$16 sps:$4 sm:$0xff]   ;;  %v2696_v3 = vld [vmem:[#allocation9 + $0x200] ss:$16 sps:$4 sm:$0xff]   ;;  %v3213_v39 = vshrl.u32 %v101_v38, 7 }
  0x4f   :  { %v2701_v4 = vld [vmem:[#allocation9 + $0x1e4] ss:$16 sps:$4 sm:$0xff]   ;;  %v2699_v6 = vld [vmem:[#allocation9 + $0x1e0] ss:$16 sps:$4 sm:$0xff]  }
  0x50   :  { %1966 = vmatpush1.bf16.msra.mxu0 %v2657_v42  ;;  %2007 = vmatpush1.bf16.msra.mxu1 %v2660_v43  ;;  %v2704_v5 = vld [vmem:[#allocation9 + $0x3e4] ss:$16 sps:$4 sm:$0xff]   ;;  %v2702_v7 = vld [vmem:[#allocation9 + $0x3e0] ss:$16 sps:$4 sm:$0xff]   ;;  %v3216_v40 = vsub.s32 0, %v3213_v39  ;;  %v3221_v42 = vsub.s32 2, %v3213_v39 }
  0x51   :  { %1967 = vmatprep.subr.bf16.mxu0 %v2665_v44  ;;  %2008 = vmatprep.subr.bf16.mxu1 %v2668_v45  ;;  %v2707_v8 = vld [vmem:[#allocation9 + $0x1c4] ss:$16 sps:$4 sm:$0xff]   ;;  %v2705_v10 = vld [vmem:[#allocation9 + $0x1c0] ss:$16 sps:$4 sm:$0xff]   ;;  %v3224_v43 = vsub.s32 1, %v3213_v39  ;;  %v3227_v44 = vsub.s32 3, %v3213_v39 }
  0x52   :  { %v2710_v9 = vld [vmem:[#allocation9 + $0x3c4] ss:$16 sps:$4 sm:$0xff]   ;;  %v2708_v11 = vld [vmem:[#allocation9 + $0x3c0] ss:$16 sps:$4 sm:$0xff]   ;;  %v104_v45 = vrot.slane %v3218_v41, %v3216_v40 }
  0x53   :  { %v2713_v12 = vld [vmem:[#allocation9 + $0x1a4] ss:$16 sps:$4 sm:$0xff]   ;;  %v2711_v14 = vld [vmem:[#allocation9 + $0x1a0] ss:$16 sps:$4 sm:$0xff]  }
  0x54   :  { %1968 = vmatpush1.bf16.msra.mxu0 %v2663_v46  ;;  %2009 = vmatpush1.bf16.msra.mxu1 %v2666_v47  ;;  %v2716_v13 = vld [vmem:[#allocation9 + $0x3a4] ss:$16 sps:$4 sm:$0xff]   ;;  %v2714_v15 = vld [vmem:[#allocation9 + $0x3a0] ss:$16 sps:$4 sm:$0xff]   ;;  %v112_v46 = vrot.slane %v3218_v41, %v3221_v42  ;;  %v108_v47 = vrot.slane %v3218_v41, %v3224_v43 }
  0x55   :  { %1969 = vmatprep.subr.bf16.mxu0 %v2671_v48  ;;  %2010 = vmatprep.subr.bf16.mxu1 %v2674_v49  ;;  %v2719_v16 = vld [vmem:[#allocation9 + $0x184] ss:$16 sps:$4 sm:$0xff]   ;;  %v2717_v18 = vld [vmem:[#allocation9 + $0x180] ss:$16 sps:$4 sm:$0xff]   ;;  %v116_v49 = vrot.slane %v3218_v41, %v3227_v44 }
  0x56   :  { %v2722_v17 = vld [vmem:[#allocation9 + $0x384] ss:$16 sps:$4 sm:$0xff]   ;;  %v2720_v19 = vld [vmem:[#allocation9 + $0x380] ss:$16 sps:$4 sm:$0xff]  }
  0x57   :  { %v2725_v20 = vld [vmem:[#allocation9 + $0x164] ss:$16 sps:$4 sm:$0xff]   ;;  %v2723_v22 = vld [vmem:[#allocation9 + $0x160] ss:$16 sps:$4 sm:$0xff]  }
  0x58   :  { %1970 = vmatpush1.bf16.msra.mxu0 %v2669_v50  ;;  %2011 = vmatpush1.bf16.msra.mxu1 %v2672_v51  ;;  %v2728_v21 = vld [vmem:[#allocation9 + $0x364] ss:$16 sps:$4 sm:$0xff]   ;;  %v2726_v23 = vld [vmem:[#allocation9 + $0x360] ss:$16 sps:$4 sm:$0xff]  }
  0x59   :  { %1971 = vmatprep.subr.bf16.mxu0 %v2677_v52  ;;  %2012 = vmatprep.subr.bf16.mxu1 %v2680_v53  ;;  %v2731_v24 = vld [vmem:[#allocation9 + $0x144] ss:$16 sps:$4 sm:$0xff]   ;;  %v2729_v26 = vld [vmem:[#allocation9 + $0x140] ss:$16 sps:$4 sm:$0xff]  }
  0x5a   :  { %v2734_v25 = vld [vmem:[#allocation9 + $0x344] ss:$16 sps:$4 sm:$0xff]   ;;  %v2732_v27 = vld [vmem:[#allocation9 + $0x340] ss:$16 sps:$4 sm:$0xff]  }
  0x5b   :  { %v2737_v28 = vld [vmem:[#allocation9 + $0x124] ss:$16 sps:$4 sm:$0xff]   ;;  %v2735_v30 = vld [vmem:[#allocation9 + $0x120] ss:$16 sps:$4 sm:$0xff]  }
  0x5c   :  { %1972 = vmatpush1.bf16.msra.mxu0 %v2675_v54  ;;  %2013 = vmatpush1.bf16.msra.mxu1 %v2678_v55  ;;  %v2740_v29 = vld [vmem:[#allocation9 + $0x324] ss:$16 sps:$4 sm:$0xff]   ;;  %v2738_v31 = vld [vmem:[#allocation9 + $0x320] ss:$16 sps:$4 sm:$0xff]  }
  0x5d   :  { %1973 = vmatprep.subr.bf16.mxu0 %v2683_v56  ;;  %2014 = vmatprep.subr.bf16.mxu1 %v2686_v57  ;;  %v2743_v32 = vld [vmem:[#allocation9 + $0x104] ss:$16 sps:$4 sm:$0xff]   ;;  %v2741_v34 = vld [vmem:[#allocation9 + $0x100] ss:$16 sps:$4 sm:$0xff]   ;;  %v123_v56 = vsub.s32 5, %v3213_v39 }
  0x5e   :  { %v2746_v33 = vld [vmem:[#allocation9 + $0x304] ss:$16 sps:$4 sm:$0xff]   ;;  %v2744_v35 = vld [vmem:[#allocation9 + $0x300] ss:$16 sps:$4 sm:$0xff]  }
  0x5f   :  { %v2749_v36 = vld [vmem:[#allocation9 + $0x4e4] ss:$16 sps:$4 sm:$0xff]  }
  0x60   :  { %1974 = vmatpush1.bf16.msra.mxu0 %v2681_v58  ;;  %2015 = vmatpush1.bf16.msra.mxu1 %v2684_v59  ;;  %v2752_v37 = vld [vmem:[#allocation9 + $0x6e4] ss:$16 sps:$4 sm:$0xff]  }
  0x61   :  { %1975 = vmatprep.subr.bf16.mxu0 %v2689_v60  ;;  %2016 = vmatprep.subr.bf16.mxu1 %v2692_v61  ;;  %v131_v61 = vsub.s32 7, %v3213_v39 }
  0x64   :  { %1976 = vmatpush1.bf16.msra.mxu0 %v2687_v62  ;;  %2017 = vmatpush1.bf16.msra.mxu1 %v2690_v63 }
  0x65   :  { %1977 = vmatprep.subr.bf16.mxu0 %v2695_v0  ;;  %2018 = vmatprep.subr.bf16.mxu1 %v2698_v2 }
  0x68   :  { %1978 = vmatpush1.bf16.msra.mxu0 %v2693_v1  ;;  %2019 = vmatpush1.bf16.msra.mxu1 %v2696_v3 }
  0x69   :  { %1979 = vmatprep.subr.bf16.mxu0 %v2701_v4  ;;  %2020 = vmatprep.subr.bf16.mxu1 %v2704_v5  ;;  %v2747_v5 = vld [vmem:[#allocation9 + $0x4e0] ss:$16 sps:$4 sm:$0xff]  }
  0x6c   :  { %1980 = vmatpush2.bf16.msra.mxu0 %v2699_v6  ;;  %2021 = vmatpush2.bf16.msra.mxu1 %v2702_v7  ;;  %v124_v6 = vrot.slane %v3218_v41, %v123_v56  ;;  %v2791_v56 = vld [vmem:[#allocation9 + $0x404] ss:$16 sps:$4 sm:$0xff]  }
  0x6d   :  { %1981 = vmatprep.subr.bf16.mxu0 %v2707_v8  ;;  %2022 = vmatprep.subr.bf16.mxu1 %v2710_v9  ;;  %v2750_v9 = vld [vmem:[#allocation9 + $0x6e0] ss:$16 sps:$4 sm:$0xff]  }
  0x70   :  { %1982 = vmatpush2.bf16.msra.mxu0 %v2705_v10  ;;  %2023 = vmatpush2.bf16.msra.mxu1 %v2708_v11  ;;  %v2755_v10 = vld [vmem:[#allocation9 + $0x4c4] ss:$16 sps:$4 sm:$0xff]  }
  0x71   :  { %1983 = vmatprep.subr.bf16.mxu0 %v2713_v12  ;;  %2024 = vmatprep.subr.bf16.mxu1 %v2716_v13  ;;  %v132_v12 = vrot.slane %v3218_v41, %v131_v61  ;;  %v2758_v13 = vld [vmem:[#allocation9 + $0x6c4] ss:$16 sps:$4 sm:$0xff]  }
  0x72   :  { %v2800_v61 = vld [vmem:[#allocation9 + $0x7e4] ss:$16 sps:$4 sm:$0xff]  }
  0x74   :  { %1984 = vmatpush2.bf16.msra.mxu0 %v2711_v14  ;;  %2025 = vmatpush2.bf16.msra.mxu1 %v2714_v15 }
  0x75   :  { %1985 = vmatprep.subr.bf16.mxu0 %v2719_v16  ;;  %2026 = vmatprep.subr.bf16.mxu1 %v2722_v17  ;;  %v2753_v16 = vld [vmem:[#allocation9 + $0x4c0] ss:$16 sps:$4 sm:$0xff]  }
  0x78   :  { %1986 = vmatpush2.bf16.msra.mxu0 %v2717_v18  ;;  %2027 = vmatpush2.bf16.msra.mxu1 %v2720_v19  ;;  %v2756_v19 = vld [vmem:[#allocation9 + $0x6c0] ss:$16 sps:$4 sm:$0xff]  }
  0x79   :  { %1987 = vmatprep.subr.bf16.mxu0 %v2725_v20  ;;  %2028 = vmatprep.subr.bf16.mxu1 %v2728_v21  ;;  %v2761_v20 = vld [vmem:[#allocation9 + $0x4a4] ss:$16 sps:$4 sm:$0xff]  }
  0x7c   :  { %1988 = vmatpush2.bf16.msra.mxu0 %v2723_v22  ;;  %2029 = vmatpush2.bf16.msra.mxu1 %v2726_v23  ;;  %v2764_v23 = vld [vmem:[#allocation9 + $0x6a4] ss:$16 sps:$4 sm:$0xff]  }
  0x7d   :  { %1989 = vmatprep.subr.bf16.mxu0 %v2731_v24  ;;  %2030 = vmatprep.subr.bf16.mxu1 %v2734_v25 }
  0x80   :  { %1990 = vmatpush2.bf16.msra.mxu0 %v2729_v26  ;;  %2031 = vmatpush2.bf16.msra.mxu1 %v2732_v27 }
  0x81   :  { %1991 = vmatprep.subr.bf16.mxu0 %v2737_v28  ;;  %2032 = vmatprep.subr.bf16.mxu1 %v2740_v29  ;;  %v2759_v28 = vld [vmem:[#allocation9 + $0x4a0] ss:$16 sps:$4 sm:$0xff]  }
  0x84   :  { %1992 = vmatpush2.bf16.msra.mxu0 %v2735_v30  ;;  %2033 = vmatpush2.bf16.msra.mxu1 %v2738_v31  ;;  %v2762_v31 = vld [vmem:[#allocation9 + $0x6a0] ss:$16 sps:$4 sm:$0xff]  }
  0x85   :  { %1993 = vmatprep.subr.bf16.mxu0 %v2743_v32  ;;  %2034 = vmatprep.subr.bf16.mxu1 %v2746_v33  ;;  %v2767_v32 = vld [vmem:[#allocation9 + $0x484] ss:$16 sps:$4 sm:$0xff]  }
  0x88   :  { %1994 = vmatpush2.bf16.msra.mxu0 %v2741_v34  ;;  %2035 = vmatpush2.bf16.msra.mxu1 %v2744_v35  ;;  %v2770_v34 = vld [vmem:[#allocation9 + $0x684] ss:$16 sps:$4 sm:$0xff]   ;;  %v2765_v35 = vld [vmem:[#allocation9 + $0x480] ss:$16 sps:$4 sm:$0xff]  }
  0x89   :  { %2045 = vmatprep.subr.bf16.mxu0 %v2749_v36  ;;  %2086 = vmatprep.subr.bf16.mxu1 %v2752_v37  ;;  %v2768_v36 = vld [vmem:[#allocation9 + $0x680] ss:$16 sps:$4 sm:$0xff]   ;;  %v2773_v37 = vld [vmem:[#allocation9 + $0x464] ss:$16 sps:$4 sm:$0xff]  }
 0x103   :  { %v259_v48 = vpop.f32.mrf.mxu0  ;;  %v300_v51 = vpop.f32.mrf.mxu1 }
 0x104   :  { %v260_v50 = vadd.f32 %v259_v48, %v104_v45  ;;  %v301_v52 = vadd.f32 %v300_v51, %v112_v46  ;;  %v2776_v45 = vld [vmem:[#allocation9 + $0x664] ss:$16 sps:$4 sm:$0xff]   ;;  %v2771_v46 = vld [vmem:[#allocation9 + $0x460] ss:$16 sps:$4 sm:$0xff]  }
 0x105   :  { %v261_v53 = vpop.f32.mrf.mxu0  ;;  %v302_v55 = vpop.f32.mrf.mxu1  ;;  %v2779_v48 = vld [vmem:[#allocation9 + $0x444] ss:$16 sps:$4 sm:$0xff]   ;;  %v2780_v51 = vld [vmem:[#allocation9 + $0x640] ss:$16 sps:$4 sm:$0xff]  }
 0x106   :  { %v262_v54 = vadd.f32 %v261_v53, %v108_v47  ;;  %v389_v57 = vmax.f32 %v260_v50, 0.0  ;;  %v391_v58 = vmax.f32 %v301_v52, 0.0  ;;  %v303_v59 = vadd.f32 %v302_v55, %v116_v49  ;;  %v2774_v47 = vld [vmem:[#allocation9 + $0x660] ss:$16 sps:$4 sm:$0xff]   ;;  %v2782_v49 = vld [vmem:[#allocation9 + $0x644] ss:$16 sps:$4 sm:$0xff]  }
 0x107   :  { %v263_v60 = vpop.f32.mrf.mxu0  ;;  %v304_v63 = vpop.f32.mrf.mxu1  ;;  %v2777_v50 = vld [vmem:[#allocation9 + $0x440] ss:$16 sps:$4 sm:$0xff]   ;;  %v2785_v52 = vld [vmem:[#allocation9 + $0x424] ss:$16 sps:$4 sm:$0xff]  }
 0x108   :  { %v390_v62 = vmax.f32 %v262_v54, 0.0  ;;  %v392_v0 = vmax.f32 %v303_v59, 0.0  ;;  %v3239_v2 = vpack.c.bf16 %v391_v58, %v391_v58  ;;  %v3244_v7 = vpack.c.bf16 %v389_v57, %v389_v57  ;;  %v2788_v53 = vld [vmem:[#allocation9 + $0x624] ss:$16 sps:$4 sm:$0xff]   ;;  %v2783_v54 = vld [vmem:[#allocation9 + $0x420] ss:$16 sps:$4 sm:$0xff]  }
 0x109   :  { %v264_v1 = vpop.f32.mrf.mxu0  ;;  %v305_v4 = vpop.f32.mrf.mxu1  ;;  %v2786_v55 = vld [vmem:[#allocation9 + $0x620] ss:$16 sps:$4 sm:$0xff]   ;;  %v2794_v57 = vld [vmem:[#allocation9 + $0x604] ss:$16 sps:$4 sm:$0xff]  }
 0x10a   :  { %v3241_v3 = vpack.c.bf16 %v390_v62, %v390_v62  ;;  %v3246_v8 = vpack.c.bf16 %v392_v0, %v392_v0  ;;  %v2789_v58 = vld [vmem:[#allocation9 + $0x400] ss:$16 sps:$4 sm:$0xff]   ;;  %v2797_v60 = vld [vmem:[#allocation9 + $0x5e4] ss:$16 sps:$4 sm:$0xff]  }
 0x10b   :  { %v3248_v11 = vpop.f32.mrf.mxu0  ;;  %v3252_v14 = vpop.f32.mrf.mxu1  ;;  %v2792_v59 = vld [vmem:[#allocation9 + $0x600] ss:$16 sps:$4 sm:$0xff]   ;;  %v2803_v0 = vld [vmem:[#allocation9 + $0x5c4] ss:$16 sps:$4 sm:$0xff]  }
 0x10c   :  { %1995 = vmatprep.mubr.bf16.mxu0 %v3241_v3  ;;  %2036 = vmatprep.mubr.bf16.mxu1 %v3246_v8  ;;  %v2795_v62 = vld [vmem:[#allocation9 + $0x5e0] ss:$16 sps:$4 sm:$0xff]   ;;  %v2806_v1 = vld [vmem:[#allocation9 + $0x7c4] ss:$16 sps:$4 sm:$0xff]  }
 0x10d   :  { %1996 = vmatmul.mubr.bf16.vlgmr.msra.gmra.mxu0 %v3244_v7  ;;  %v343_v15 = vpop.f32.mrf.mxu0  ;;  %2037 = vmatmul.mubr.bf16.vlgmr.msra.gmra.mxu1 %v3239_v2  ;;  %v384_v18 = vpop.f32.mrf.mxu1  ;;  %v2798_v63 = vld [vmem:[#allocation9 + $0x7e0] ss:$16 sps:$4 sm:$0xff]  }
 0x10e   :  { %2046 = vmatpush1.bf16.msra.mxu0 %v2747_v5  ;;  %v344_v17 = vadd.f32 %v343_v15, %v124_v6  ;;  %2087 = vmatpush1.bf16.msra.mxu1 %v2750_v9  ;;  %v385_v22 = vadd.f32 %v384_v18, %v132_v12  ;;  %v2801_v4 = vld [vmem:[#allocation9 + $0x5c0] ss:$16 sps:$4 sm:$0xff]   ;;  %v2809_v6 = vld [vmem:[#allocation9 + $0x5a4] ss:$16 sps:$4 sm:$0xff]  }
 0x10f   :  { %2047 = vmatprep.subr.bf16.mxu0 %v2755_v10  ;;  %v345_v21 = vpop.f32.mrf.mxu0  ;;  %2088 = vmatprep.subr.bf16.mxu1 %v2758_v13  ;;  %v386_v25 = vpop.f32.mrf.mxu1  ;;  %v2804_v5 = vld [vmem:[#allocation9 + $0x7c0] ss:$16 sps:$4 sm:$0xff]   ;;  %v2812_v9 = vld [vmem:[#allocation9 + $0x7a4] ss:$16 sps:$4 sm:$0xff]  }
 0x110   :  { %v394_v24 = vmax.f32 %v344_v17, 0.0  ;;  %v396_v26 = vmax.f32 %v385_v22, 0.0  ;;  %v2807_v10 = vld [vmem:[#allocation9 + $0x5a0] ss:$16 sps:$4 sm:$0xff]   ;;  %v2815_v13 = vld [vmem:[#allocation9 + $0x584] ss:$16 sps:$4 sm:$0xff]  }
 0x111   :  { %v346_v27 = vpop.f32.mrf.mxu0  ;;  %v387_v30 = vpop.f32.mrf.mxu1  ;;  %v2810_v12 = vld [vmem:[#allocation9 + $0x7a0] ss:$16 sps:$4 sm:$0xff]   ;;  %v2818_v15 = vld [vmem:[#allocation9 + $0x784] ss:$16 sps:$4 sm:$0xff]   ;;  %v127_v21 = vsub.s32 6, %v3213_v39 }
 0x112   :  { %2048 = vmatpush1.bf16.msra.mxu0 %v2753_v16  ;;  %v3257_v29 = vpack.c.bf16 %v394_v24, %v394_v24  ;;  %2089 = vmatpush1.bf16.msra.mxu1 %v2756_v19  ;;  %v3259_v33 = vpack.c.bf16 %v396_v26, %v396_v26  ;;  %v2813_v16 = vld [vmem:[#allocation9 + $0x580] ss:$16 sps:$4 sm:$0xff]   ;;  %v2821_v18 = vld [vmem:[#allocation9 + $0x564] ss:$16 sps:$4 sm:$0xff]  }
 0x113   :  { %2049 = vmatprep.subr.bf16.mxu0 %v2761_v20  ;;  %2090 = vmatprep.subr.bf16.mxu1 %v2764_v23  ;;  %v2816_v17 = vld [vmem:[#allocation9 + $0x780] ss:$16 sps:$4 sm:$0xff]   ;;  %v2824_v19 = vld [vmem:[#allocation9 + $0x764] ss:$16 sps:$4 sm:$0xff]   ;;  %v119_v23 = vsub.s32 4, %v3213_v39  ;;  %v128_v26 = vrot.slane %v3218_v41, %v127_v21 }
 0x114   :  { %2077 = vmatprep.mubr.bf16.mxu0 %v3257_v29  ;;  %2118 = vmatprep.mubr.bf16.mxu1 %v3259_v33  ;;  %v2819_v20 = vld [vmem:[#allocation9 + $0x560] ss:$16 sps:$4 sm:$0xff]   ;;  %v2827_v24 = vld [vmem:[#allocation9 + $0x544] ss:$16 sps:$4 sm:$0xff]   ;;  %v2888_v21 = vld [vmem:[#allocation9 + $0x208] ss:$16 sps:$4 sm:$0xff]  }
 0x115   :  { %v2822_v22 = vld [vmem:[#allocation9 + $0x760] ss:$16 sps:$4 sm:$0xff]   ;;  %v2830_v25 = vld [vmem:[#allocation9 + $0x744] ss:$16 sps:$4 sm:$0xff]  }
 0x116   :  { %2050 = vmatpush1.bf16.msra.mxu0 %v2759_v28  ;;  %2091 = vmatpush1.bf16.msra.mxu1 %v2762_v31  ;;  %v2825_v27 = vld [vmem:[#allocation9 + $0x540] ss:$16 sps:$4 sm:$0xff]   ;;  %v120_v28 = vrot.slane %v3218_v41, %v119_v23  ;;  %v2833_v31 = vld [vmem:[#allocation9 + $0x524] ss:$16 sps:$4 sm:$0xff]   ;;  %v2896_v23 = vld [vmem:[#allocation9 + $0x3ec] ss:$16 sps:$4 sm:$0xff]  }
 0x117   :  { %2051 = vmatprep.subr.bf16.mxu0 %v2767_v32  ;;  %2092 = vmatprep.subr.bf16.mxu1 %v2770_v34  ;;  %v2828_v30 = vld [vmem:[#allocation9 + $0x740] ss:$16 sps:$4 sm:$0xff]   ;;  %v2836_v32 = vld [vmem:[#allocation9 + $0x724] ss:$16 sps:$4 sm:$0xff]   ;;  %v383_v34 = vadd.f32 %v3252_v14, %v128_v26  ;;  %v2848_v14 = vld [vmem:[#allocation9 + $0x2ec] ss:$16 sps:$4 sm:$0xff]  }
 0x118   :  { %v2837_v41 = vld [vmem:[#allocation9 + $0x500] ss:$16 sps:$4 sm:$0xff]   ;;  %v2899_v26 = vld [vmem:[#allocation9 + $0x1cc] ss:$16 sps:$4 sm:$0xff]  }
 0x11a   :  { %2052 = vmatpush1.bf16.msra.mxu0 %v2765_v35  ;;  %2093 = vmatpush1.bf16.msra.mxu1 %v2768_v36  ;;  %v2831_v35 = vld [vmem:[#allocation9 + $0x520] ss:$16 sps:$4 sm:$0xff]   ;;  %v342_v36 = vadd.f32 %v3248_v11, %v120_v28  ;;  %v2843_v11 = vld [vmem:[#allocation9 + $0xe8] ss:$16 sps:$4 sm:$0xff]  }
 0x11b   :  { %2053 = vmatprep.subr.bf16.mxu0 %v2773_v37  ;;  %2094 = vmatprep.subr.bf16.mxu1 %v2776_v45  ;;  %v2834_v37 = vld [vmem:[#allocation9 + $0x720] ss:$16 sps:$4 sm:$0xff]   ;;  %v2839_v45 = vld [vmem:[#allocation9 + $0x504] ss:$16 sps:$4 sm:$0xff]   ;;  %v2897_v28 = vld [vmem:[#allocation9 + $0x1c8] ss:$16 sps:$4 sm:$0xff]  }
 0x11e   :  { %2054 = vmatpush1.bf16.msra.mxu0 %v2771_v46  ;;  %2095 = vmatpush1.bf16.msra.mxu1 %v2774_v47  ;;  %v2842_v46 = vld [vmem:[#allocation9 + $0x704] ss:$16 sps:$4 sm:$0xff]   ;;  %v395_v47 = vmax.f32 %v383_v34, 0.0  ;;  %v2903_v34 = vld [vmem:[#allocation9 + $0x1a8] ss:$16 sps:$4 sm:$0xff]  }
 0x11f   :  { %2055 = vmatprep.subr.bf16.mxu0 %v2779_v48  ;;  %2096 = vmatprep.subr.bf16.mxu1 %v2782_v49  ;;  %v393_v48 = vmax.f32 %v342_v36, 0.0  ;;  %v2840_v49 = vld [vmem:[#allocation9 + $0x700] ss:$16 sps:$4 sm:$0xff]   ;;  %v2911_v36 = vld [vmem:[#allocation9 + $0x18c] ss:$16 sps:$4 sm:$0xff]  }
 0x122   :  { %2056 = vmatpush1.bf16.msra.mxu0 %v2777_v50  ;;  %2097 = vmatpush1.bf16.msra.mxu1 %v2780_v51  ;;  %v2845_v50 = vld [vmem:[#allocation9 + $0xec] ss:$16 sps:$4 sm:$0xff]   ;;  %v3269_v51 = vpack.c.bf16 %v395_v47, %v395_v47 }
 0x123   :  { %2057 = vmatprep.subr.bf16.mxu0 %v2785_v52  ;;  %2098 = vmatprep.subr.bf16.mxu1 %v2788_v53  ;;  %v3271_v52 = vpack.c.bf16 %v393_v48, %v393_v48  ;;  %v2846_v53 = vld [vmem:[#allocation9 + $0x2e8] ss:$16 sps:$4 sm:$0xff]   ;;  %v2917_v47 = vld [vmem:[#allocation9 + $0x16c] ss:$16 sps:$4 sm:$0xff]  }
 0x124   :  { %v2915_v48 = vld [vmem:[#allocation9 + $0x168] ss:$16 sps:$4 sm:$0xff]  }
 0x126   :  { %2058 = vmatpush1.bf16.msra.mxu0 %v2783_v54  ;;  %2099 = vmatpush1.bf16.msra.mxu1 %v2786_v55  ;;  %v2851_v54 = vld [vmem:[#allocation9 + $0xcc] ss:$16 sps:$4 sm:$0xff]  }
 0x127   :  { %2059 = vmatprep.subr.bf16.mxu0 %v2791_v56  ;;  %2100 = vmatprep.subr.bf16.mxu1 %v2794_v57  ;;  %v2854_v55 = vld [vmem:[#allocation9 + $0x2cc] ss:$16 sps:$4 sm:$0xff]   ;;  %v2849_v56 = vld [vmem:[#allocation9 + $0xc8] ss:$16 sps:$4 sm:$0xff]  }
 0x128   :  { %v2852_v57 = vld [vmem:[#allocation9 + $0x2c8] ss:$16 sps:$4 sm:$0xff]  }
 0x12a   :  { %2060 = vmatpush1.bf16.msra.mxu0 %v2789_v58  ;;  %2101 = vmatpush1.bf16.msra.mxu1 %v2792_v59  ;;  %v2857_v58 = vld [vmem:[#allocation9 + $0xac] ss:$16 sps:$4 sm:$0xff]  }
 0x12b   :  { %2061 = vmatprep.subr.bf16.mxu0 %v2797_v60  ;;  %2102 = vmatprep.subr.bf16.mxu1 %v2800_v61  ;;  %v2860_v59 = vld [vmem:[#allocation9 + $0x2ac] ss:$16 sps:$4 sm:$0xff]   ;;  %v2855_v60 = vld [vmem:[#allocation9 + $0xa8] ss:$16 sps:$4 sm:$0xff]  }
 0x12c   :  { %v2858_v61 = vld [vmem:[#allocation9 + $0x2a8] ss:$16 sps:$4 sm:$0xff]  }
 0x12e   :  { %2062 = vmatpush2.bf16.msra.mxu0 %v2795_v62  ;;  %2103 = vmatpush2.bf16.msra.mxu1 %v2798_v63  ;;  %v2863_v62 = vld [vmem:[#allocation9 + $0x8c] ss:$16 sps:$4 sm:$0xff]  }
 0x12f   :  { %2063 = vmatprep.subr.bf16.mxu0 %v2803_v0  ;;  %2104 = vmatprep.subr.bf16.mxu1 %v2806_v1  ;;  %v2866_v63 = vld [vmem:[#allocation9 + $0x28c] ss:$16 sps:$4 sm:$0xff]   ;;  %v2861_v0 = vld [vmem:[#allocation9 + $0x88] ss:$16 sps:$4 sm:$0xff]  }
 0x130   :  { %v2869_v1 = vld [vmem:[#allocation9 + $0x6c] ss:$16 sps:$4 sm:$0xff]  }
 0x132   :  { %2064 = vmatpush2.bf16.msra.mxu0 %v2801_v4  ;;  %2105 = vmatpush2.bf16.msra.mxu1 %v2804_v5  ;;  %v2872_v4 = vld [vmem:[#allocation9 + $0x26c] ss:$16 sps:$4 sm:$0xff]   ;;  %v2870_v5 = vld [vmem:[#allocation9 + $0x268] ss:$16 sps:$4 sm:$0xff]  }
 0x133   :  { %2065 = vmatprep.subr.bf16.mxu0 %v2809_v6  ;;  %2106 = vmatprep.subr.bf16.mxu1 %v2812_v9  ;;  %v2875_v6 = vld [vmem:[#allocation9 + $0x4c] ss:$16 sps:$4 sm:$0xff]  }
 0x134   :  { %v2878_v9 = vld [vmem:[#allocation9 + $0x24c] ss:$16 sps:$4 sm:$0xff]  }
 0x136   :  { %2066 = vmatpush2.bf16.msra.mxu0 %v2807_v10  ;;  %2107 = vmatpush2.bf16.msra.mxu1 %v2810_v12  ;;  %v2873_v10 = vld [vmem:[#allocation9 + $0x48] ss:$16 sps:$4 sm:$0xff]  }
 0x137   :  { %2067 = vmatprep.subr.bf16.mxu0 %v2815_v13  ;;  %2108 = vmatprep.subr.bf16.mxu1 %v2818_v15  ;;  %v2876_v12 = vld [vmem:[#allocation9 + $0x248] ss:$16 sps:$4 sm:$0xff]   ;;  %v2881_v13 = vld [vmem:[#allocation9 + $0x2c] ss:$16 sps:$4 sm:$0xff]  }
 0x138   :  { %v2884_v15 = vld [vmem:[#allocation9 + $0x22c] ss:$16 sps:$4 sm:$0xff]  }
 0x13a   :  { %2068 = vmatpush2.bf16.msra.mxu0 %v2813_v16  ;;  %2109 = vmatpush2.bf16.msra.mxu1 %v2816_v17  ;;  %v2879_v16 = vld [vmem:[#allocation9 + $0x28] ss:$16 sps:$4 sm:$0xff]  }
 0x13b   :  { %2069 = vmatprep.subr.bf16.mxu0 %v2821_v18  ;;  %2110 = vmatprep.subr.bf16.mxu1 %v2824_v19  ;;  %v2882_v17 = vld [vmem:[#allocation9 + $0x228] ss:$16 sps:$4 sm:$0xff]   ;;  %v2887_v18 = vld [vmem:[#allocation9 + $0xc] ss:$16 sps:$4 sm:$0xff]  }
 0x13c   :  { %v2890_v19 = vld [vmem:[#allocation9 + $0x20c] ss:$16 sps:$4 sm:$0xff]  }
 0x13e   :  { %2070 = vmatpush2.bf16.msra.mxu0 %v2819_v20  ;;  %2111 = vmatpush2.bf16.msra.mxu1 %v2822_v22  ;;  %v2885_v20 = vld [vmem:[#allocation9 + $0x8] ss:$16 sps:$4 sm:$0xff]   ;;  %v2893_v22 = vld [vmem:[#allocation9 + $0x1ec] ss:$16 sps:$4 sm:$0xff]  }
 0x13f   :  { %2071 = vmatprep.subr.bf16.mxu0 %v2827_v24  ;;  %2112 = vmatprep.subr.bf16.mxu1 %v2830_v25  ;;  %v2891_v24 = vld [vmem:[#allocation9 + $0x1e8] ss:$16 sps:$4 sm:$0xff]  }
 0x140   :  { %v2894_v25 = vld [vmem:[#allocation9 + $0x3e8] ss:$16 sps:$4 sm:$0xff]  }
 0x142   :  { %2072 = vmatpush2.bf16.msra.mxu0 %v2825_v27  ;;  %2113 = vmatpush2.bf16.msra.mxu1 %v2828_v30  ;;  %v2902_v27 = vld [vmem:[#allocation9 + $0x3cc] ss:$16 sps:$4 sm:$0xff]   ;;  %v2900_v30 = vld [vmem:[#allocation9 + $0x3c8] ss:$16 sps:$4 sm:$0xff]  }
 0x143   :  { %2073 = vmatprep.subr.bf16.mxu0 %v2833_v31  ;;  %2114 = vmatprep.subr.bf16.mxu1 %v2836_v32  ;;  %v2905_v31 = vld [vmem:[#allocation9 + $0x1ac] ss:$16 sps:$4 sm:$0xff]  }
 0x144   :  { %v2908_v32 = vld [vmem:[#allocation9 + $0x3ac] ss:$16 sps:$4 sm:$0xff]  }
 0x146   :  { %2074 = vmatpush2.bf16.msra.mxu0 %v2831_v35  ;;  %2115 = vmatpush2.bf16.msra.mxu1 %v2834_v37  ;;  %v2906_v35 = vld [vmem:[#allocation9 + $0x3a8] ss:$16 sps:$4 sm:$0xff]   ;;  %v2914_v37 = vld [vmem:[#allocation9 + $0x38c] ss:$16 sps:$4 sm:$0xff]  }
 0x147   :  { %2075 = vmatprep.subr.bf16.mxu0 %v2839_v45  ;;  %2116 = vmatprep.subr.bf16.mxu1 %v2842_v46  ;;  %v2909_v45 = vld [vmem:[#allocation9 + $0x188] ss:$16 sps:$4 sm:$0xff]  }
 0x148   :  { %v2912_v46 = vld [vmem:[#allocation9 + $0x388] ss:$16 sps:$4 sm:$0xff]  }
 0x14a   :  { %2076 = vmatpush2.bf16.msra.mxu0 %v2837_v41  ;;  %2117 = vmatpush2.bf16.msra.mxu1 %v2840_v49  ;;  %v2920_v41 = vld [vmem:[#allocation9 + $0x36c] ss:$16 sps:$4 sm:$0xff]   ;;  %v2918_v49 = vld [vmem:[#allocation9 + $0x368] ss:$16 sps:$4 sm:$0xff]  }
 0x14b   :  { %2127 = vmatprep.subr.bf16.mxu0 %v2845_v50  ;;  %2168 = vmatprep.subr.bf16.mxu1 %v2848_v14  ;;  %v2923_v50 = vld [vmem:[#allocation9 + $0x14c] ss:$16 sps:$4 sm:$0xff]  }
 0x14c   :  { %v2926_v14 = vld [vmem:[#allocation9 + $0x34c] ss:$16 sps:$4 sm:$0xff]  }
 0x14d   :  { %2078 = vmatmul.mubr.bf16.vlgmr.msra.gmra.mxu0 %v3271_v52  ;;  %2119 = vmatmul.mubr.bf16.vlgmr.msra.gmra.mxu1 %v3269_v51 }
 0x14e   :  { %2128 = vmatpush1.bf16.msra.mxu0 %v2843_v11  ;;  %2159 = vmatprep.mubr.bf16.mxu0 %v3241_v3  ;;  %v2864_v3 = vld [vmem:[#allocation9 + $0x288] ss:$16 sps:$4 sm:$0xff]  }
 0x14f   :  { %2169 = vmatpush1.bf16.msra.mxu1 %v2846_v53  ;;  %2200 = vmatprep.mubr.bf16.mxu1 %v3246_v8  ;;  %v2867_v8 = vld [vmem:[#allocation9 + $0x68] ss:$16 sps:$4 sm:$0xff]  }
 0x150   :  { %2129 = vmatprep.subr.bf16.mxu0 %v2851_v54  ;;  %2170 = vmatprep.subr.bf16.mxu1 %v2854_v55  ;;  %v2921_v11 = vld [vmem:[#allocation9 + $0x148] ss:$16 sps:$4 sm:$0xff]   ;;  %v2929_v54 = vld [vmem:[#allocation9 + $0x12c] ss:$16 sps:$4 sm:$0xff]  }
 0x151   :  { %v2924_v53 = vld [vmem:[#allocation9 + $0x348] ss:$16 sps:$4 sm:$0xff]   ;;  %v2932_v55 = vld [vmem:[#allocation9 + $0x32c] ss:$16 sps:$4 sm:$0xff]  }
 0x152   :  { %2130 = vmatpush1.bf16.msra.mxu0 %v2849_v56  ;;  %v2927_v56 = vld [vmem:[#allocation9 + $0x128] ss:$16 sps:$4 sm:$0xff]  }
 0x153   :  { %2171 = vmatpush1.bf16.msra.mxu1 %v2852_v57  ;;  %2131 = vmatprep.subr.bf16.mxu0 %v2857_v58  ;;  %v2930_v57 = vld [vmem:[#allocation9 + $0x328] ss:$16 sps:$4 sm:$0xff]   ;;  %v2935_v58 = vld [vmem:[#allocation9 + $0x10c] ss:$16 sps:$4 sm:$0xff]  }
 0x154   :  { %2172 = vmatprep.subr.bf16.mxu1 %v2860_v59  ;;  %v2938_v59 = vld [vmem:[#allocation9 + $0x30c] ss:$16 sps:$4 sm:$0xff]  }
 0x156   :  { %2132 = vmatpush1.bf16.msra.mxu0 %v2855_v60  ;;  %v2933_v60 = vld [vmem:[#allocation9 + $0x108] ss:$16 sps:$4 sm:$0xff]  }
 0x157   :  { %2173 = vmatpush1.bf16.msra.mxu1 %v2858_v61  ;;  %2133 = vmatprep.subr.bf16.mxu0 %v2863_v62  ;;  %v2936_v61 = vld [vmem:[#allocation9 + $0x308] ss:$16 sps:$4 sm:$0xff]   ;;  %v2941_v62 = vld [vmem:[#allocation9 + $0x4ec] ss:$16 sps:$4 sm:$0xff]  }
 0x158   :  { %2174 = vmatprep.subr.bf16.mxu1 %v2866_v63  ;;  %v2944_v63 = vld [vmem:[#allocation9 + $0x6ec] ss:$16 sps:$4 sm:$0xff]  }
 0x15a   :  { %2134 = vmatpush1.bf16.msra.mxu0 %v2861_v0  ;;  %v2939_v0 = vld [vmem:[#allocation9 + $0x4e8] ss:$16 sps:$4 sm:$0xff]  }
 0x15b   :  { %2175 = vmatpush1.bf16.msra.mxu1 %v2864_v3  ;;  %2135 = vmatprep.subr.bf16.mxu0 %v2869_v1  ;;  %v2942_v3 = vld [vmem:[#allocation9 + $0x6e8] ss:$16 sps:$4 sm:$0xff]   ;;  %v2947_v1 = vld [vmem:[#allocation9 + $0x4cc] ss:$16 sps:$4 sm:$0xff]  }
 0x15c   :  { %2176 = vmatprep.subr.bf16.mxu1 %v2872_v4  ;;  %v2950_v4 = vld [vmem:[#allocation9 + $0x6cc] ss:$16 sps:$4 sm:$0xff]  }
 0x15e   :  { %2136 = vmatpush1.bf16.msra.mxu0 %v2867_v8  ;;  %v2945_v8 = vld [vmem:[#allocation9 + $0x4c8] ss:$16 sps:$4 sm:$0xff]  }
 0x15f   :  { %2177 = vmatpush1.bf16.msra.mxu1 %v2870_v5  ;;  %2137 = vmatprep.subr.bf16.mxu0 %v2875_v6  ;;  %v2948_v5 = vld [vmem:[#allocation9 + $0x6c8] ss:$16 sps:$4 sm:$0xff]   ;;  %v2953_v6 = vld [vmem:[#allocation9 + $0x4ac] ss:$16 sps:$4 sm:$0xff]  }
 0x160   :  { %2178 = vmatprep.subr.bf16.mxu1 %v2878_v9  ;;  %v2956_v9 = vld [vmem:[#allocation9 + $0x6ac] ss:$16 sps:$4 sm:$0xff]  }
 0x162   :  { %2138 = vmatpush1.bf16.msra.mxu0 %v2873_v10  ;;  %v2951_v10 = vld [vmem:[#allocation9 + $0x4a8] ss:$16 sps:$4 sm:$0xff]  }
 0x163   :  { %2179 = vmatpush1.bf16.msra.mxu1 %v2876_v12  ;;  %2139 = vmatprep.subr.bf16.mxu0 %v2881_v13  ;;  %v2959_v12 = vld [vmem:[#allocation9 + $0x48c] ss:$16 sps:$4 sm:$0xff]   ;;  %v2957_v13 = vld [vmem:[#allocation9 + $0x488] ss:$16 sps:$4 sm:$0xff]  }
 0x164   :  { %2180 = vmatprep.subr.bf16.mxu1 %v2884_v15  ;;  %v2965_v15 = vld [vmem:[#allocation9 + $0x46c] ss:$16 sps:$4 sm:$0xff]  }
 0x166   :  { %2140 = vmatpush1.bf16.msra.mxu0 %v2879_v16  ;;  %v2968_v16 = vld [vmem:[#allocation9 + $0x66c] ss:$16 sps:$4 sm:$0xff]  }
 0x167   :  { %2181 = vmatpush1.bf16.msra.mxu1 %v2882_v17  ;;  %2141 = vmatprep.subr.bf16.mxu0 %v2887_v18  ;;  %v2966_v17 = vld [vmem:[#allocation9 + $0x668] ss:$16 sps:$4 sm:$0xff]   ;;  %v2971_v18 = vld [vmem:[#allocation9 + $0x44c] ss:$16 sps:$4 sm:$0xff]  }
 0x168   :  { %2182 = vmatprep.subr.bf16.mxu1 %v2890_v19  ;;  %v2974_v19 = vld [vmem:[#allocation9 + $0x64c] ss:$16 sps:$4 sm:$0xff]  }
 0x16a   :  { %2142 = vmatpush1.bf16.msra.mxu0 %v2885_v20  ;;  %v2969_v20 = vld [vmem:[#allocation9 + $0x448] ss:$16 sps:$4 sm:$0xff]  }
 0x16b   :  { %2183 = vmatpush1.bf16.msra.mxu1 %v2888_v21  ;;  %2143 = vmatprep.subr.bf16.mxu0 %v2893_v22  ;;  %v2972_v21 = vld [vmem:[#allocation9 + $0x648] ss:$16 sps:$4 sm:$0xff]   ;;  %v2977_v22 = vld [vmem:[#allocation9 + $0x42c] ss:$16 sps:$4 sm:$0xff]  }
 0x16c   :  { %2184 = vmatprep.subr.bf16.mxu1 %v2896_v23  ;;  %v2980_v23 = vld [vmem:[#allocation9 + $0x62c] ss:$16 sps:$4 sm:$0xff]  }
 0x16e   :  { %2144 = vmatpush2.bf16.msra.mxu0 %v2891_v24  ;;  %v2975_v24 = vld [vmem:[#allocation9 + $0x428] ss:$16 sps:$4 sm:$0xff]  }
 0x16f   :  { %2185 = vmatpush2.bf16.msra.mxu1 %v2894_v25  ;;  %2145 = vmatprep.subr.bf16.mxu0 %v2899_v26  ;;  %v2978_v25 = vld [vmem:[#allocation9 + $0x628] ss:$16 sps:$4 sm:$0xff]   ;;  %v2983_v26 = vld [vmem:[#allocation9 + $0x40c] ss:$16 sps:$4 sm:$0xff]  }
 0x170   :  { %2186 = vmatprep.subr.bf16.mxu1 %v2902_v27  ;;  %v2986_v27 = vld [vmem:[#allocation9 + $0x60c] ss:$16 sps:$4 sm:$0xff]  }
 0x172   :  { %2146 = vmatpush2.bf16.msra.mxu0 %v2897_v28  ;;  %v2981_v28 = vld [vmem:[#allocation9 + $0x408] ss:$16 sps:$4 sm:$0xff]  }
 0x173   :  { %2187 = vmatpush2.bf16.msra.mxu1 %v2900_v30  ;;  %2147 = vmatprep.subr.bf16.mxu0 %v2905_v31  ;;  %v2984_v30 = vld [vmem:[#allocation9 + $0x608] ss:$16 sps:$4 sm:$0xff]   ;;  %v2989_v31 = vld [vmem:[#allocation9 + $0x5ec] ss:$16 sps:$4 sm:$0xff]  }
 0x174   :  { %2188 = vmatprep.subr.bf16.mxu1 %v2908_v32  ;;  %v2992_v32 = vld [vmem:[#allocation9 + $0x7ec] ss:$16 sps:$4 sm:$0xff]  }
 0x176   :  { %2148 = vmatpush2.bf16.msra.mxu0 %v2903_v34  ;;  %v2987_v34 = vld [vmem:[#allocation9 + $0x5e8] ss:$16 sps:$4 sm:$0xff]  }
 0x177   :  { %2189 = vmatpush2.bf16.msra.mxu1 %v2906_v35  ;;  %2149 = vmatprep.subr.bf16.mxu0 %v2911_v36  ;;  %v2990_v35 = vld [vmem:[#allocation9 + $0x7e8] ss:$16 sps:$4 sm:$0xff]   ;;  %v2995_v36 = vld [vmem:[#allocation9 + $0x5cc] ss:$16 sps:$4 sm:$0xff]  }
 0x178   :  { %2190 = vmatprep.subr.bf16.mxu1 %v2914_v37  ;;  %v2998_v37 = vld [vmem:[#allocation9 + $0x7cc] ss:$16 sps:$4 sm:$0xff]  }
 0x17a   :  { %2150 = vmatpush2.bf16.msra.mxu0 %v2909_v45  ;;  %v2993_v45 = vld [vmem:[#allocation9 + $0x5c8] ss:$16 sps:$4 sm:$0xff]  }
 0x17b   :  { %2191 = vmatpush2.bf16.msra.mxu1 %v2912_v46  ;;  %2151 = vmatprep.subr.bf16.mxu0 %v2917_v47  ;;  %v2996_v46 = vld [vmem:[#allocation9 + $0x7c8] ss:$16 sps:$4 sm:$0xff]   ;;  %v3001_v47 = vld [vmem:[#allocation9 + $0x5ac] ss:$16 sps:$4 sm:$0xff]  }
 0x17c   :  { %2192 = vmatprep.subr.bf16.mxu1 %v2920_v41  ;;  %v3004_v41 = vld [vmem:[#allocation9 + $0x7ac] ss:$16 sps:$4 sm:$0xff]  }
 0x17e   :  { %2152 = vmatpush2.bf16.msra.mxu0 %v2915_v48  ;;  %v2999_v48 = vld [vmem:[#allocation9 + $0x5a8] ss:$16 sps:$4 sm:$0xff]  }
 0x17f   :  { %2193 = vmatpush2.bf16.msra.mxu1 %v2918_v49  ;;  %2153 = vmatprep.subr.bf16.mxu0 %v2923_v50  ;;  %v3002_v49 = vld [vmem:[#allocation9 + $0x7a8] ss:$16 sps:$4 sm:$0xff]   ;;  %v3007_v50 = vld [vmem:[#allocation9 + $0x58c] ss:$16 sps:$4 sm:$0xff]  }
 0x180   :  { %2194 = vmatprep.subr.bf16.mxu1 %v2926_v14  ;;  %v3010_v14 = vld [vmem:[#allocation9 + $0x78c] ss:$16 sps:$4 sm:$0xff]  }
 0x182   :  { %2154 = vmatpush2.bf16.msra.mxu0 %v2921_v11  ;;  %v3005_v11 = vld [vmem:[#allocation9 + $0x588] ss:$16 sps:$4 sm:$0xff]  }
 0x183   :  { %2195 = vmatpush2.bf16.msra.mxu1 %v2924_v53  ;;  %2155 = vmatprep.subr.bf16.mxu0 %v2929_v54  ;;  %v3008_v53 = vld [vmem:[#allocation9 + $0x788] ss:$16 sps:$4 sm:$0xff]   ;;  %v3013_v54 = vld [vmem:[#allocation9 + $0x56c] ss:$16 sps:$4 sm:$0xff]  }
 0x184   :  { %2196 = vmatprep.subr.bf16.mxu1 %v2932_v55  ;;  %v3016_v55 = vld [vmem:[#allocation9 + $0x76c] ss:$16 sps:$4 sm:$0xff]  }
 0x186   :  { %2156 = vmatpush2.bf16.msra.mxu0 %v2927_v56  ;;  %v3011_v56 = vld [vmem:[#allocation9 + $0x568] ss:$16 sps:$4 sm:$0xff]  }
 0x187   :  { %2197 = vmatpush2.bf16.msra.mxu1 %v2930_v57  ;;  %2157 = vmatprep.subr.bf16.mxu0 %v2935_v58  ;;  %v3014_v57 = vld [vmem:[#allocation9 + $0x768] ss:$16 sps:$4 sm:$0xff]   ;;  %v3019_v58 = vld [vmem:[#allocation9 + $0x54c] ss:$16 sps:$4 sm:$0xff]  }
 0x188   :  { %2198 = vmatprep.subr.bf16.mxu1 %v2938_v59  ;;  %v3022_v59 = vld [vmem:[#allocation9 + $0x74c] ss:$16 sps:$4 sm:$0xff]  }
 0x18a   :  { %2158 = vmatpush2.bf16.msra.mxu0 %v2933_v60  ;;  %v3017_v60 = vld [vmem:[#allocation9 + $0x548] ss:$16 sps:$4 sm:$0xff]  }
 0x18b   :  { %2199 = vmatpush2.bf16.msra.mxu1 %v2936_v61  ;;  %2209 = vmatprep.subr.bf16.mxu0 %v2941_v62  ;;  %v3020_v61 = vld [vmem:[#allocation9 + $0x748] ss:$16 sps:$4 sm:$0xff]   ;;  %v3025_v62 = vld [vmem:[#allocation9 + $0x52c] ss:$16 sps:$4 sm:$0xff]  }
 0x18c   :  { %2250 = vmatprep.subr.bf16.mxu1 %v2944_v63  ;;  %v3028_v63 = vld [vmem:[#allocation9 + $0x72c] ss:$16 sps:$4 sm:$0xff]  }
 0x18d   :  { %2160 = vmatmul.mubr.bf16.vlgmr.msra.gmra.mxu0 %v3244_v7  ;;  %v2954_v7 = vld [vmem:[#allocation9 + $0x6a8] ss:$16 sps:$4 sm:$0xff]  }
 0x18e   :  { %2201 = vmatmul.mubr.bf16.vlgmr.msra.gmra.mxu1 %v3239_v2  ;;  %2210 = vmatpush1.bf16.msra.mxu0 %v2939_v0  ;;  %v2962_v2 = vld [vmem:[#allocation9 + $0x68c] ss:$16 sps:$4 sm:$0xff]   ;;  %v3023_v0 = vld [vmem:[#allocation9 + $0x528] ss:$16 sps:$4 sm:$0xff]  }
 0x18f   :  { %2241 = vmatprep.mubr.bf16.mxu0 %v3257_v29  ;;  %2251 = vmatpush1.bf16.msra.mxu1 %v2942_v3  ;;  %v2960_v29 = vld [vmem:[#allocation9 + $0x688] ss:$16 sps:$4 sm:$0xff]  }
 0x190   :  { %2282 = vmatprep.mubr.bf16.mxu1 %v3259_v33  ;;  %2211 = vmatprep.subr.bf16.mxu0 %v2947_v1  ;;  %v2963_v33 = vld [vmem:[#allocation9 + $0x468] ss:$16 sps:$4 sm:$0xff]   ;;  %v3031_v1 = vld [vmem:[#allocation9 + $0x50c] ss:$16 sps:$4 sm:$0xff]  }
 0x191   :  { %2252 = vmatprep.subr.bf16.mxu1 %v2950_v4  ;;  %v3026_v3 = vld [vmem:[#allocation9 + $0x728] ss:$16 sps:$4 sm:$0xff]   ;;  %v3034_v4 = vld [vmem:[#allocation9 + $0x70c] ss:$16 sps:$4 sm:$0xff]  }
 0x192   :  { %2212 = vmatpush1.bf16.msra.mxu0 %v2945_v8  ;;  %v3029_v8 = vld [vmem:[#allocation9 + $0x508] ss:$16 sps:$4 sm:$0xff]  }
 0x193   :  { %2253 = vmatpush1.bf16.msra.mxu1 %v2948_v5  ;;  %2213 = vmatprep.subr.bf16.mxu0 %v2953_v6  ;;  %v3032_v5 = vld [vmem:[#allocation9 + $0x708] ss:$16 sps:$4 sm:$0xff]   ;;  %v661_v6 = vld [vmem:[%s3307_s4] sm:$0xf] }
 0x194   :  { %2254 = vmatprep.subr.bf16.mxu1 %v2956_v9  ;;  %v666_v9 = vrot.slane %v661_v6, %v3216_v40 }
 0x196   :  { %2214 = vmatpush1.bf16.msra.mxu0 %v2951_v10  ;;  %v670_v10 = vrot.slane %v661_v6, %v3224_v43 }
 0x197   :  { %2255 = vmatpush1.bf16.msra.mxu1 %v2954_v7  ;;  %2215 = vmatprep.subr.bf16.mxu0 %v2959_v12 }
 0x198   :  { %2256 = vmatprep.subr.bf16.mxu1 %v2962_v2 }
 0x19a   :  { %2216 = vmatpush1.bf16.msra.mxu0 %v2957_v13 }
 0x19b   :  { %2257 = vmatpush1.bf16.msra.mxu1 %v2960_v29  ;;  %2217 = vmatprep.subr.bf16.mxu0 %v2965_v15 }
 0x19c   :  { %2258 = vmatprep.subr.bf16.mxu1 %v2968_v16 }
 0x19e   :  { %2218 = vmatpush1.bf16.msra.mxu0 %v2963_v33 }
 0x19f   :  { %2259 = vmatpush1.bf16.msra.mxu1 %v2966_v17  ;;  %2219 = vmatprep.subr.bf16.mxu0 %v2971_v18 }
 0x1a0   :  { %2260 = vmatprep.subr.bf16.mxu1 %v2974_v19 }
 0x1a2   :  { %2220 = vmatpush1.bf16.msra.mxu0 %v2969_v20 }
 0x1a3   :  { %2261 = vmatpush1.bf16.msra.mxu1 %v2972_v21  ;;  %2221 = vmatprep.subr.bf16.mxu0 %v2977_v22 }
 0x1a4   :  { %2262 = vmatprep.subr.bf16.mxu1 %v2980_v23 }
 0x1a6   :  { %2222 = vmatpush1.bf16.msra.mxu0 %v2975_v24 }
 0x1a7   :  { %2263 = vmatpush1.bf16.msra.mxu1 %v2978_v25  ;;  %2223 = vmatprep.subr.bf16.mxu0 %v2983_v26 }
 0x1a8   :  { %2264 = vmatprep.subr.bf16.mxu1 %v2986_v27 }
 0x1aa   :  { %2224 = vmatpush1.bf16.msra.mxu0 %v2981_v28 }
 0x1ab   :  { %2265 = vmatpush1.bf16.msra.mxu1 %v2984_v30  ;;  %2225 = vmatprep.subr.bf16.mxu0 %v2989_v31 }
 0x1ac   :  { %2266 = vmatprep.subr.bf16.mxu1 %v2992_v32 }
 0x1ae   :  { %2226 = vmatpush2.bf16.msra.mxu0 %v2987_v34 }
 0x1af   :  { %2267 = vmatpush2.bf16.msra.mxu1 %v2990_v35  ;;  %2227 = vmatprep.subr.bf16.mxu0 %v2995_v36 }
 0x1b0   :  { %2268 = vmatprep.subr.bf16.mxu1 %v2998_v37 }
 0x1b2   :  { %2228 = vmatpush2.bf16.msra.mxu0 %v2993_v45 }
 0x1b3   :  { %2269 = vmatpush2.bf16.msra.mxu1 %v2996_v46  ;;  %2229 = vmatprep.subr.bf16.mxu0 %v3001_v47 }
 0x1b4   :  { %2270 = vmatprep.subr.bf16.mxu1 %v3004_v41 }
 0x1b6   :  { %2230 = vmatpush2.bf16.msra.mxu0 %v2999_v48 }
 0x1b7   :  { %2271 = vmatpush2.bf16.msra.mxu1 %v3002_v49  ;;  %2231 = vmatprep.subr.bf16.mxu0 %v3007_v50 }
 0x1b8   :  { %2272 = vmatprep.subr.bf16.mxu1 %v3010_v14 }
 0x1ba   :  { %2232 = vmatpush2.bf16.msra.mxu0 %v3005_v11 }
 0x1bb   :  { %2273 = vmatpush2.bf16.msra.mxu1 %v3008_v53  ;;  %2233 = vmatprep.subr.bf16.mxu0 %v3013_v54 }
 0x1bc   :  { %2274 = vmatprep.subr.bf16.mxu1 %v3016_v55  ;;  %v674_v55 = vrot.slane %v661_v6, %v3221_v42 }
 0x1be   :  { %2234 = vmatpush2.bf16.msra.mxu0 %v3011_v56  ;;  %v678_v56 = vrot.slane %v661_v6, %v3227_v44 }
 0x1bf   :  { %2275 = vmatpush2.bf16.msra.mxu1 %v3014_v57  ;;  %2235 = vmatprep.subr.bf16.mxu0 %v3019_v58 }
 0x1c0   :  { %2276 = vmatprep.subr.bf16.mxu1 %v3022_v59 }
 0x1c2   :  { %2236 = vmatpush2.bf16.msra.mxu0 %v3017_v60 }
 0x1c3   :  { %2277 = vmatpush2.bf16.msra.mxu1 %v3020_v61  ;;  %2237 = vmatprep.subr.bf16.mxu0 %v3025_v62 }
 0x1c4   :  { %2278 = vmatprep.subr.bf16.mxu1 %v3028_v63 }
 0x1c6   :  { %2238 = vmatpush2.bf16.msra.mxu0 %v3023_v0 }
 0x1c7   :  { %2279 = vmatpush2.bf16.msra.mxu1 %v3026_v3  ;;  %2239 = vmatprep.subr.bf16.mxu0 %v3031_v1 }
 0x1c8   :  { %2280 = vmatprep.subr.bf16.mxu1 %v3034_v4 }
 0x1ca   :  { %2240 = vmatpush2.bf16.msra.mxu0 %v3029_v8 }
 0x1cb   :  { %2281 = vmatpush2.bf16.msra.mxu1 %v3032_v5 }
 0x1cd   :  { %2242 = vmatmul.mubr.bf16.vlgmr.msra.gmra.mxu0 %v3271_v52  ;;  %v1997_v7 = vpop.f32.mrf.mxu0  ;;  %v2038_v2 = vpop.f32.mrf.mxu1  ;;  %v2295_v52 = vld [vmem:[%s3308_s5] sm:$0xf]  ;;  %s3152_s5 = smov [#allocation11]  }
 0x1ce   :  { %2283 = vmatmul.mubr.bf16.vlgmr.msra.gmra.mxu1 %v3269_v51  ;;  %v1998_v12 = vadd.f32 %v1997_v7, %v666_v9  ;;  %v2300_v30 = vrot.slane %v2295_v52, %v3216_v40  ;;  %v2304_v32 = vrot.slane %v2295_v52, %v3224_v43  ;;  %v2308_v3 = vrot.slane %v2295_v52, %v3221_v42  ;;  %s2353_s25 = sshll.u32 %s3152_s5, 4  ;;  %s2354_s25 = int_to_ptr.vmem [resolvable:$true] %s2353_s25 }
 0x1cf   :  { %v1999_v13 = vpop.f32.mrf.mxu0  ;;  %v2040_v16 = vpop.f32.mrf.mxu1  ;;  %v2312_v7 = vrot.slane %v2295_v52, %v3227_v44  ;;  %v2339_v42 = vand.u32 127, %v101_v38  ;;  %s3115_s26 = scalar_lea.vmem %s2354_s25, 16  ;;  %s3119_s27 = scalar_lea.vmem %s2354_s25, 32 }
 0x1d0   :  { %v2039_v29 = vadd.f32 %v2038_v2, %v1998_v12  ;;  %v2000_v15 = vadd.f32 %v1999_v13, %v670_v10  ;;  %p3116_p6 = scmp.ne.s32.totalorder %s2354_s25, %s3115_s26  ;;  %p3120_p7 = scmp.lt.s32.totalorder %s2354_s25, %s2354_s25 }
 0x1d1   :  { %v2001_v33 = vpop.f32.mrf.mxu0  ;;  %v2042_v18 = vpop.f32.mrf.mxu1  ;;  %p3121_p8 = scmp.lt.s32.totalorder %s3119_s27, %s3115_s26 }
 0x1d2   :  { %v2041_v17 = vadd.f32 %v2040_v16, %v2000_v15  ;;  %v2326_v33 = vld [vmem:[#allocation2] sm:$0x1] }
 0x1d3   :  { %v2002_v19 = vpop.f32.mrf.mxu0  ;;  %v2043_v20 = vpop.f32.mrf.mxu1  ;;  %p3122_p9 = por %p3121_p8, %p3120_p7 }
 0x1d4   :  { %v2342_v19 = vsub.s32 %v2339_v42, %v3213_v39 }
 0x1d5   :  { %p3123_p10 = pnand %p3122_p9, %p3116_p6 }
 0x20d   :  { %v2079_v21 = vpop.f32.mrf.mxu0  ;;  %v2120_v23 = vpop.f32.mrf.mxu1 }
 0x20e   :  { %v2080_v22 = vadd.f32 %v2079_v21, %v2039_v29 }
 0x20f   :  { %v2081_v24 = vpop.f32.mrf.mxu0  ;;  %v2122_v26 = vpop.f32.mrf.mxu1 }
 0x210   :  { %v2121_v51 = vadd.f32 %v2120_v23, %v2080_v22  ;;  %v2082_v25 = vadd.f32 %v2081_v24, %v2041_v17 }
 0x211   :  { %v2083_v27 = vpop.f32.mrf.mxu0  ;;  %v2124_v34 = vpop.f32.mrf.mxu1 }
 0x212   :  { %v2291_v28 = vmax.f32 %v2121_v51, 0.0  ;;  %v2123_v31 = vadd.f32 %v2122_v26, %v2082_v25 }
 0x213   :  { %v2084_v35 = vpop.f32.mrf.mxu0  ;;  %v2125_v37 = vpop.f32.mrf.mxu1 }
 0x214   :  { %v2292_v36 = vmax.f32 %v2123_v31, 0.0  ;;  %v2317_v45 = vmul.f32 %v2300_v30, %v2291_v28 }
 0x216   :  { %v2318_v46 = vmul.f32 %v2304_v32, %v2292_v36 }
 0x218   :  { %v2321_v47 = vadd.f32 %v2318_v46, %v2317_v45 }
 0x24d   :  { %v2161_v41 = vpop.f32.mrf.mxu0 }
 0x24e   :  { %v2202_v48 = vpop.f32.mrf.mxu1  ;;  %v2162_v43 = vadd.f32 %v2161_v41, %v674_v55 }
 0x24f   :  { %v2163_v49 = vpop.f32.mrf.mxu0 }
 0x250   :  { %v2204_v50 = vpop.f32.mrf.mxu1  ;;  %v2164_v57 = vadd.f32 %v2163_v49, %v678_v56  ;;  %v2203_v58 = vadd.f32 %v2202_v48, %v2162_v43 }
 0x251   :  { %v2165_v14 = vpop.f32.mrf.mxu0 }
 0x252   :  { %v2206_v11 = vpop.f32.mrf.mxu1  ;;  %v2205_v60 = vadd.f32 %v2204_v50, %v2164_v57 }
 0x253   :  { %v2166_v53 = vpop.f32.mrf.mxu0 }
 0x254   :  { %v2207_v54 = vpop.f32.mrf.mxu1 }
 0x28d   :  { %v2243_v59 = vpop.f32.mrf.mxu0 }
 0x28e   :  { %v2244_v61 = vadd.f32 %v2243_v59, %v2203_v58  ;;  %v2284_v62 = vpop.f32.mrf.mxu1 }
 0x28f   :  { %v2245_v63 = vpop.f32.mrf.mxu0 }
 0x290   :  { %v2285_v0 = vadd.f32 %v2284_v62, %v2244_v61  ;;  %v2246_v1 = vadd.f32 %v2245_v63, %v2205_v60  ;;  %v2286_v4 = vpop.f32.mrf.mxu1 }
 0x291   :  { %v2247_v8 = vpop.f32.mrf.mxu0 }
 0x292   :  { %v2293_v5 = vmax.f32 %v2285_v0, 0.0  ;;  %v2287_v9 = vadd.f32 %v2286_v4, %v2246_v1  ;;  %v2288_v10 = vpop.f32.mrf.mxu1 }
 0x293   :  { %v2248_v6 = vpop.f32.mrf.mxu0 }
 0x294   :  { %v2319_v12 = vmul.f32 %v2308_v3, %v2293_v5  ;;  %v2294_v2 = vmax.f32 %v2287_v9, 0.0  ;;  %v2289_v13 = vpop.f32.mrf.mxu1 }
 0x296   :  { %v2320_v29 = vmul.f32 %v2312_v7, %v2294_v2  ;;  %v2322_v15 = vadd.f32 %v2321_v47, %v2319_v12 }
 0x298   :  { %v2323_v16 = vadd.f32 %v2322_v15, %v2320_v29 }
 0x29a   :  { %2324 = vadd.xlane.f32.xlu0 %v2323_v16 }
 0x2b0   :  { %2329 = vperm.xlu0 %2650, %v2326_v33  }
 0x323   :  { %v2325_v17 = vpop.xlane.xlu0 %2324 }
 0x32b   :  { %v2330_v18 = vpop.permute.xlu0 %2329 }
 0x32c   :  { %v2335_v20 = vrot.slane %v2330_v18, %v3216_v40 }
 0x32e   :  { %v2336_v44 = vadd.f32 %v2335_v20, %v2325_v17 }
 0x330   :  { %v2343_v21 = vrot.slane %v2336_v44, %v2342_v19 }
 0x332   :  { %2346 = vst.msk [vmem:[#allocation11] sm:$0x1] %vm2345_vm1, %v2343_v21 }
 0x333   :  { %3126 = shalt.err (!%p3123_p10)
}
 0x334   :  { %2356 = dma.vmem_to_hbm [thread:$0]  %s2354_s25, 16, %s3310_s7, [#allocation5]  }
 0x335   :  { %3141 = dma.done.wait [#allocation5], 16  }
 0x336   :  { %3142 = vsyncadd [#allocation5], 4294967280 }
 0x337   :  { %2360 = vsyncpa [#allocation4], 1 }
 0x338   :  { %2361 = vsyncpa [#allocation7], 1 }
 0x339   :  { %2362 = vsyncpa [#allocation10], 1 }
 0x33a   :  { %2363 = vsyncpa [#allocation5], 1 }

</bundles_post_ra>
